<compile_context>
chip_gen: v5e
topology: v5e:2x2
jax: 0.10.0
libtpu: 0.0.40
codegen_flags: <defaults>
</compile_context>

<pallas_src>
from functools import partial

import jax
import jax.numpy as jnp
from jax import lax
from jax.experimental import pallas as pl
from jax.experimental.pallas import tpu as pltpu

TAU = 0.05
VMEM_LIMIT = 32 * 1024 * 1024   # explicit budget; safe default on v5e/v6e/v7x


# --------------------------------------------------------------------------
# Kernel A: affinity + softmax over the joint (2, L) axis + memory readout.
#   mk_ref : (Ck, 2L)   raw kappa, both slots packed along L
#   qk_ref : (Ck, HWt)  query key, already l2-normalized and pre-scaled by 1/tau
#   mv_ref : (Cv, 2L)   memory nu, both slots packed along L
# --------------------------------------------------------------------------
def affinity_kernel(mk_ref, qk_ref, mv_ref, mem_ref, eaff_ref):
    mk = mk_ref[...]
    mk_n = mk / (jnp.sqrt(jnp.sum(mk * mk, axis=0, keepdims=True)) + 1e-6)

    dn = (((0,), (0,)), ((), ()))                    # contract over Ck
    a = lax.dot_general(mk_n, qk_ref[...], dn,
                        preferred_element_type=jnp.float32)   # (2L, HWt) = aff/tau

    m = jnp.max(a, axis=0, keepdims=True)            # joint max over (2, L)
    e = jnp.exp(a - m)                               # == exp((aff - max)/tau)
    denom = jnp.sum(e, axis=0, keepdims=True)
    inv = pl.reciprocal(denom, approx=True)          # EUP, frees the VALU slot
    p = e * inv

    eaff_ref[...] = e.astype(eaff_ref.dtype)         # bf16 writeback
    mem_ref[...] = jnp.dot(mv_ref[...], p,
                           preferred_element_type=jnp.float32)  # (Cv, HWt)


def affinity_pallas(qk_s, mk2, mv2):
    # qk_s: (B, Ck, HW) normalized & scaled;  mk2: (B,N,Ck,2L);  mv2: (B,N,Cv,2L)
    B, Ck, HW = qk_s.shape
    _, N, _, twoL = mk2.shape
    Cv = mv2.shape[2]

    # HW tiling: full HW for small maps; 512-lane tiles for large ones (v7x VMEM).
    hw_tile = HW if (HW < 1024 or HW % 512 != 0) else 512
    n_hw = HW // hw_tile

    out_shapes = (jax.ShapeDtypeStruct((B, N, Cv, HW), jnp.float32),
                  jax.ShapeDtypeStruct((B, N, twoL, HW), jnp.bfloat16))
    mem_out, exp_aff = pl.pallas_call(
        affinity_kernel,
        grid=(B, N, n_hw),
        in_specs=[
            pl.BlockSpec((None, None, Ck, twoL), lambda b, n, h: (b, n, 0, 0)),
            pl.BlockSpec((None, Ck, hw_tile), lambda b, n, h: (b, 0, h)),
            pl.BlockSpec((None, None, Cv, twoL), lambda b, n, h: (b, n, 0, 0)),
        ],
        out_specs=(
            pl.BlockSpec((None, None, Cv, hw_tile), lambda b, n, h: (b, n, 0, h)),
            pl.BlockSpec((None, None, twoL, hw_tile), lambda b, n, h: (b, n, 0, h)),
        ),
        out_shape=out_shapes,
        compiler_params=pltpu.CompilerParams(
            dimension_semantics=("parallel", "parallel", "parallel"),
            vmem_limit_bytes=VMEM_LIMIT),
    )(mk2, qk_s, mv2)
    return mem_out, exp_aff


# --------------------------------------------------------------------------
# Kernel B: FeatureFusionLayer — one im2col matmul per image, fused f/a weights,
# channel-major (lane-dense) output.
#   x_ref : (bn_blk, 9*Cin, HW) pre-im2col'd activations
#   w_ref : (2*Cout, 9*Cin)     [W_f ; W_a] packed along rows
#   b_ref : (2*Cout, 1)         [b_f ; b_a]
#   o_ref : (bn_blk, Cout, HW)
# --------------------------------------------------------------------------
def conv_gate_kernel(x_ref, w_ref, b_ref, o_ref):
    bn_blk, Cout, _ = o_ref.shape
    w = w_ref[...]
    bias = b_ref[...]
    for i in range(bn_blk):                           # static, small
        acc = jnp.dot(w, x_ref[i], preferred_element_type=jnp.float32) + bias
        f = acc[:Cout]
        a = acc[Cout:]
        o_ref[i] = (f * jax.nn.sigmoid(a)).astype(o_ref.dtype)


def conv_gate_pallas(x_nchw, w_packed, b_packed):
    BN, Cin, H, W = x_nchw.shape
    two_cout = w_packed.shape[0]
    Cout = two_cout // 2
    HW = H * W

    # im2col in the XLA wrapper (no per-tap relayouts inside the kernel).
    xp = jnp.pad(x_nchw, ((0, 0), (0, 0), (1, 1), (1, 1)))
    taps = [xp[:, :, ky:ky + H, kx:kx + W] for ky in range(3) for kx in range(3)]
    patches = jnp.concatenate(taps, axis=1).reshape(BN, 9 * Cin, HW)

    # batch several images per grid step to amortize per-step overhead
    bn_blk = 1
    for d in range(min(BN, 8), 0, -1):
        if BN % d == 0:
            bn_blk = d
            break

    out = pl.pallas_call(
        conv_gate_kernel,
        grid=(BN // bn_blk,),
        in_specs=[
            pl.BlockSpec((bn_blk, 9 * Cin, HW), lambda g: (g, 0, 0)),
            pl.BlockSpec((two_cout, 9 * Cin), lambda g: (0, 0)),
            pl.BlockSpec((two_cout, 1), lambda g: (0, 0)),
        ],
        out_specs=pl.BlockSpec((bn_blk, Cout, HW), lambda g: (g, 0, 0)),
        out_shape=jax.ShapeDtypeStruct((BN, Cout, HW), jnp.float32),
        compiler_params=pltpu.CompilerParams(
            dimension_semantics=("parallel",),
            vmem_limit_bytes=VMEM_LIMIT),
    )(patches, w_packed, b_packed)
    return out.reshape(BN, Cout, H, W)


# --------------------------------------------------------------------------
# Glue: perm_inv_feat (top-k + prefix sum) and the full matching() pipeline
# --------------------------------------------------------------------------
def perm_inv_feat(exp_aff, H, W, topl):
    # exp_aff: (B, N, 2L, HW) (bf16 from kernel A)  ->  (B*N, 2*topl, H, W)
    B, N, twoL, _ = exp_aff.shape
    L = twoL // 2
    # TODO(synk): torch.topk has no clean in-kernel Pallas equivalent; top-k is
    # done here with jax.lax.top_k in plain JAX glue.
    aff = exp_aff.reshape(B * N, 2, L, H, W)
    a = jnp.moveaxis(aff, 2, -1)                                # (BN, 2, H, W, L)
    top = jax.lax.top_k(a, topl)[0].astype(jnp.float32)         # sorted descending
    feat = jnp.moveaxis(jnp.cumsum(top, axis=-1), -1, 2)        # (BN, 2, topl, H, W)
    f = feat[:, 0] / (feat[:, 0] + feat[:, 1])
    return jnp.concatenate([f, 1.0 - f], axis=1)                # (BN, 2*topl, H, W)


@partial(jax.jit, static_argnums=(8,))
def _swem_forward(qk, qv, mk, mv, wf, wa, bf, ba, topl):
    B, Ck, H, W = qk.shape
    N, L = mk.shape[1], mk.shape[-1]
    Cv = mv.shape[-2]
    HW = H * W
    Cout = wf.shape[-1]

    # Hoisted qk l2-norm (was recomputed per object) + fold 1/tau into qk.
    qk_flat = qk.reshape(B, Ck, HW)
    qk_n = qk_flat / (jnp.sqrt(jnp.sum(qk_flat * qk_flat, axis=1, keepdims=True)) + 1e-6)
    qk_s = qk_n * (1.0 / TAU)

    # Pack the two memory slots along L (matches torch's flatten(start_dim=2,3)).
    mk2 = jnp.swapaxes(mk, 2, 3).reshape(B, N, Ck, 2 * L)
    mv2 = jnp.swapaxes(mv, 2, 3).reshape(B, N, Cv, 2 * L)

    mem_out, exp_aff = affinity_pallas(qk_s, mk2, mv2)           # kernel A
    S = perm_inv_feat(exp_aff, H, W, topl)                       # (BN, 2*topl, H, W)

    mem_out = mem_out.reshape(B * N, Cv, H, W)
    qv_e = jnp.broadcast_to(qv[:, None], (B, N, Cv, H, W)).reshape(B * N, Cv, H, W)
    x = jnp.concatenate([mem_out, qv_e, S], axis=1)              # NCHW, no transpose

    # Fuse the f/a conv weights along Cout; taps ordered (ky, kx, ci).
    w_f_mat = jnp.transpose(wf, (3, 0, 1, 2)).reshape(Cout, -1)
    w_a_mat = jnp.transpose(wa, (3, 0, 1, 2)).reshape(Cout, -1)
    w_packed = jnp.concatenate([w_f_mat, w_a_mat], axis=0)        # (2*Cout, 9*Cin)
    b_packed = jnp.concatenate([bf.reshape(-1), ba.reshape(-1)]).reshape(2 * Cout, 1)

    return conv_gate_pallas(x, w_packed, b_packed)               # kernel B (NCHW out)


def swem_matching(qk, qv, mk, mv, wf, wa, bf, ba, topl):
    return _swem_forward(qk, qv, mk, mv, wf, wa, bf, ba, topl), mk.shape[1]


# --------------------------------------------------------------------------
# Pure-JAX f32 reference (mirrors the PyTorch math) for a correctness check
# --------------------------------------------------------------------------
def reference(qk, qv, mk, mv, wf, wa, bf, ba, topl, tau=TAU):
    B, Ck, H, W = qk.shape
    N, L = mk.shape[1], mk.shape[-1]
    Cv = mv.shape[-2]
    qk_n = qk / (jnp.linalg.norm(qk, axis=1, keepdims=True) + 1e-6)
    mk_n = mk / (jnp.linalg.norm(mk, axis=-2, keepdims=True) + 1e-6)
    qk_ = qk_n.reshape(B, 1, 1, Ck, H * W)
    aff = jnp.matmul(jnp.swapaxes(mk_n, -2, -1), qk_)            # (B,N,2,L,HW)
    maxes = jnp.max(aff, axis=(2, 3), keepdims=True)
    exp_aff = jnp.exp((aff - maxes) / tau)
    p_aff = exp_aff / jnp.sum(exp_aff, axis=(2, 3), keepdims=True)
    p_aff = p_aff.reshape(B, N, 2 * L, H * W)
    S = perm_inv_feat(exp_aff.reshape(B, N, 2 * L, H * W), H, W, topl)
    mv_f = jnp.swapaxes(mv, 2, 3).reshape(B, N, Cv, 2 * L)
    mem_out = jnp.matmul(mv_f, p_aff).reshape(B * N, Cv, H, W)
    qv_e = jnp.broadcast_to(qv[:, None], (B, N, Cv, H, W)).reshape(B * N, Cv, H, W)
    x = jnp.concatenate([mem_out, qv_e, S], axis=1)
    wf_oihw = jnp.transpose(wf, (3, 2, 0, 1))
    wa_oihw = jnp.transpose(wa, (3, 2, 0, 1))
    dn = ('NCHW', 'OIHW', 'NCHW')
    f = lax.conv_general_dilated(x, wf_oihw, (1, 1), 'SAME',
                                 dimension_numbers=dn) + bf.reshape(1, -1, 1, 1)
    a = lax.conv_general_dilated(x, wa_oihw, (1, 1), 'SAME',
                                 dimension_numbers=dn) + ba.reshape(1, -1, 1, 1)
    return f * jax.nn.sigmoid(a)


if __name__ == "__main__":
    # Small shapes consistent with the module:
    #   valdim=32, n_bases=16, topl=min(16, 8)=8, B=1, N=2 objects, 8x8 spatial
    B, N = 1, 2
    Ck, Cv = 16, 32            # key dim, valdim
    H = W = 8
    L = 16                     # n_bases
    topl = 8
    Cin = 2 * Cv + 2 * topl    # FeatureFusionLayer indim = valdim*2 + topl*2

    key = jax.random.PRNGKey(0)
    ks = jax.random.split(key, 6)
    qk = jax.random.normal(ks[0], (B, Ck, H, W), jnp.float32)
    qv = jax.random.normal(ks[1], (B, Cv, H, W), jnp.float32)
    # memory bases (kappa / nu) — deterministic random_init-style initialization
    mk = jax.random.normal(ks[2], (B, N, 2, Ck, L), jnp.float32) * (2.0 / L) ** 0.5
    mv = jax.random.normal(ks[3], (B, N, 2, Cv, L), jnp.float32)
    # fusion-layer conv weights in (kh, kw, Cin, Cout); biases zero as in torch init.
    # TODO(synk): torch uses nn.init.orthogonal_; deterministic normal init used here.
    wf = jax.random.normal(ks[4], (3, 3, Cin, Cv), jnp.float32) * 0.05
    wa = jax.random.normal(ks[5], (3, 3, Cin, Cv), jnp.float32) * 0.05
    bf = jnp.zeros((1, Cv), jnp.float32)
    ba = jnp.zeros((1, Cv), jnp.float32)

    out, n_objs = swem_matching(qk, qv, mk, mv, wf, wa, bf, ba, topl)
    out = jax.block_until_ready(out)

    ref = reference(qk, qv, mk, mv, wf, wa, bf, ba, topl)
    assert out.shape == (B * N, Cv, H, W)
    assert n_objs == N
    assert jnp.allclose(out, ref, rtol=2e-2, atol=2e-2)
    print("KERNEL_OK")
</pallas_src>

<mosaic_0001>
module attributes {stable_mosaic.version = 11 : i64} {
  func.func @affinity_kernel(%arg0: i32, %arg1: i32, %arg2: i32, %arg3: memref<1x1x16x32xf32, #tpu.memory_space<vmem>>, %arg4: memref<1x16x64xf32, #tpu.memory_space<vmem>>, %arg5: memref<1x1x32x32xf32, #tpu.memory_space<vmem>>, %arg6: memref<1x1x32x64xf32, #tpu.memory_space<vmem>>, %arg7: memref<1x1x32x64xbf16, #tpu.memory_space<vmem>>) attributes {dimension_semantics = [#tpu.dimension_semantics<parallel>, #tpu.dimension_semantics<parallel>, #tpu.dimension_semantics<parallel>], iteration_bounds = array<i64: 1, 2, 1>, scalar_prefetch = 0 : i64, scratch_operands = 0 : i64, tpu.core_type = #tpu.core_type<tc>, window_params = [{transform_indices = @transform_0, window_bounds = array<i64: 1, 1, 16, 32>}, {transform_indices = @transform_1, window_bounds = array<i64: 1, 16, 64>}, {transform_indices = @transform_2, window_bounds = array<i64: 1, 1, 32, 32>}, {transform_indices = @transform_3, window_bounds = array<i64: 1, 1, 32, 64>}, {transform_indices = @transform_4, window_bounds = array<i64: 1, 1, 32, 64>}]} {
    %c0 = arith.constant 0 : index
    %c0_0 = arith.constant 0 : index
    %c0_1 = arith.constant 0 : index
    %c0_2 = arith.constant 0 : index
    %0 = vector.load %arg3[%c0, %c0_0, %c0_1, %c0_2] : memref<1x1x16x32xf32, #tpu.memory_space<vmem>>, vector<1x1x16x32xf32>
    %1 = vector.shape_cast %0 : vector<1x1x16x32xf32> to vector<16x32xf32>
    %2 = arith.mulf %1, %1 : vector<16x32xf32>
    %cst = arith.constant dense<0.000000e+00> : vector<32xf32>
    %3 = vector.multi_reduction <add>, %2, %cst [0] : vector<16x32xf32> to vector<32xf32>
    %4 = vector.shape_cast %3 : vector<32xf32> to vector<1x32xf32>
    %5 = math.sqrt %4 : vector<1x32xf32>
    %cst_3 = arith.constant 9.99999997E-7 : f32
    %6 = vector.broadcast %cst_3 : f32 to vector<1x32xf32>
    %7 = arith.addf %5, %6 : vector<1x32xf32>
    %8 = vector.broadcast %7 : vector<1x32xf32> to vector<16x32xf32>
    %9 = arith.divf %1, %8 : vector<16x32xf32>
    %c0_4 = arith.constant 0 : index
    %c0_5 = arith.constant 0 : index
    %c0_6 = arith.constant 0 : index
    %10 = vector.load %arg4[%c0_4, %c0_5, %c0_6] : memref<1x16x64xf32, #tpu.memory_space<vmem>>, vector<1x16x64xf32>
    %11 = vector.shape_cast %10 : vector<1x16x64xf32> to vector<16x64xf32>
    %cst_7 = arith.constant dense<0.000000e+00> : vector<32x64xf32>
    %12 = tpu.matmul %9, %11, %cst_7 {dimension_numbers = #tpu.dot_dimension_numbers<[0], [0], [1], [1], [0, 1, 1, 1], [], []>} : vector<16x32xf32>, vector<16x64xf32>, vector<32x64xf32> -> vector<32x64xf32>
    %cst_8 = arith.constant dense<0xFF800000> : vector<64xf32>
    %13 = vector.multi_reduction <maximumf>, %12, %cst_8 [0] : vector<32x64xf32> to vector<64xf32>
    %14 = vector.shape_cast %13 : vector<64xf32> to vector<1x64xf32>
    %15 = vector.broadcast %14 : vector<1x64xf32> to vector<32x64xf32>
    %16 = arith.subf %12, %15 : vector<32x64xf32>
    %17 = math.exp %16 : vector<32x64xf32>
    %cst_9 = arith.constant dense<0.000000e+00> : vector<64xf32>
    %18 = vector.multi_reduction <add>, %17, %cst_9 [0] : vector<32x64xf32> to vector<64xf32>
    %19 = vector.shape_cast %18 : vector<64xf32> to vector<1x64xf32>
    %20 = tpu.reciprocal %19 {approx = true} : vector<1x64xf32> -> vector<1x64xf32>
    %21 = vector.broadcast %20 : vector<1x64xf32> to vector<32x64xf32>
    %22 = arith.mulf %17, %21 : vector<32x64xf32>
    %23 = arith.truncf %17 : vector<32x64xf32> to vector<32x64xbf16>
    %c0_10 = arith.constant 0 : index
    %c0_11 = arith.constant 0 : index
    %c0_12 = arith.constant 0 : index
    %c0_13 = arith.constant 0 : index
    %24 = vector.load %arg7[%c0_10, %c0_11, %c0_12, %c0_13] : memref<1x1x32x64xbf16, #tpu.memory_space<vmem>>, vector<1x1x32x64xbf16>
    %25 = vector.shape_cast %24 : vector<1x1x32x64xbf16> to vector<32x64xbf16>
    %26 = vector.shape_cast %23 : vector<32x64xbf16> to vector<1x1x32x64xbf16>
    tpu.vector_store %arg7[%c0_10, %c0_11, %c0_12, %c0_13], %26 {strides = array<i32>} : memref<1x1x32x64xbf16, #tpu.memory_space<vmem>>, vector<1x1x32x64xbf16>,
    %c0_14 = arith.constant 0 : index
    %c0_15 = arith.constant 0 : index
    %c0_16 = arith.constant 0 : index
    %c0_17 = arith.constant 0 : index
    %27 = vector.load %arg5[%c0_14, %c0_15, %c0_16, %c0_17] : memref<1x1x32x32xf32, #tpu.memory_space<vmem>>, vector<1x1x32x32xf32>
    %28 = vector.shape_cast %27 : vector<1x1x32x32xf32> to vector<32x32xf32>
    %cst_18 = arith.constant dense<0.000000e+00> : vector<32x64xf32>
    %29 = tpu.matmul %28, %22, %cst_18 {dimension_numbers = #tpu.dot_dimension_numbers<[1], [0], [0], [1], [0, 0, 1, 1], [], []>} : vector<32x32xf32>, vector<32x64xf32>, vector<32x64xf32> -> vector<32x64xf32>
    %c0_19 = arith.constant 0 : index
    %c0_20 = arith.constant 0 : index
    %c0_21 = arith.constant 0 : index
    %c0_22 = arith.constant 0 : index
    %30 = vector.load %arg6[%c0_19, %c0_20, %c0_21, %c0_22] : memref<1x1x32x64xf32, #tpu.memory_space<vmem>>, vector<1x1x32x64xf32>
    %31 = vector.shape_cast %30 : vector<1x1x32x64xf32> to vector<32x64xf32>
    %32 = vector.shape_cast %29 : vector<32x64xf32> to vector<1x1x32x64xf32>
    tpu.vector_store %arg6[%c0_19, %c0_20, %c0_21, %c0_22], %32 {strides = array<i32>} : memref<1x1x32x64xf32, #tpu.memory_space<vmem>>, vector<1x1x32x64xf32>,
    return
  }
  func.func @transform_0(%arg0: i32, %arg1: i32, %arg2: i32) -> (i32, i32, i32, i32) {
    %c0_i32 = arith.constant 0 : i32
    %c0_i32_0 = arith.constant 0 : i32
    %c0_i32_1 = arith.constant 0 : i32
    return %arg0, %arg1, %c0_i32, %c0_i32_0 : i32, i32, i32, i32
  }
  func.func @transform_1(%arg0: i32, %arg1: i32, %arg2: i32) -> (i32, i32, i32) {
    %c0_i32 = arith.constant 0 : i32
    %c0_i32_0 = arith.constant 0 : i32
    return %arg0, %c0_i32, %arg2 : i32, i32, i32
  }
  func.func @transform_2(%arg0: i32, %arg1: i32, %arg2: i32) -> (i32, i32, i32, i32) {
    %c0_i32 = arith.constant 0 : i32
    %c0_i32_0 = arith.constant 0 : i32
    %c0_i32_1 = arith.constant 0 : i32
    return %arg0, %arg1, %c0_i32, %c0_i32_0 : i32, i32, i32, i32
  }
  func.func @transform_3(%arg0: i32, %arg1: i32, %arg2: i32) -> (i32, i32, i32, i32) {
    %c0_i32 = arith.constant 0 : i32
    %c0_i32_0 = arith.constant 0 : i32
    return %arg0, %arg1, %c0_i32, %arg2 : i32, i32, i32, i32
  }
  func.func @transform_4(%arg0: i32, %arg1: i32, %arg2: i32) -> (i32, i32, i32, i32) {
    %c0_i32 = arith.constant 0 : i32
    %c0_i32_0 = arith.constant 0 : i32
    return %arg0, %arg1, %c0_i32, %arg2 : i32, i32, i32, i32
  }
}

module attributes {stable_mosaic.version = 11 : i64} {
  func.func @conv_gate_kernel(%arg0: i32, %arg1: memref<2x720x64xf32, #tpu.memory_space<vmem>>, %arg2: memref<64x720xf32, #tpu.memory_space<vmem>>, %arg3: memref<64x1xf32, #tpu.memory_space<vmem>>, %arg4: memref<2x32x64xf32, #tpu.memory_space<vmem>>) attributes {dimension_semantics = [#tpu.dimension_semantics<parallel>], iteration_bounds = array<i64: 1>, scalar_prefetch = 0 : i64, scratch_operands = 0 : i64, tpu.core_type = #tpu.core_type<tc>, window_params = [{transform_indices = @transform_0, window_bounds = array<i64: 2, 720, 64>}, {pipeline_mode = #tpu.pipeline_mode<synchronous>, transform_indices = @transform_1, window_bounds = array<i64: 64, 720>}, {pipeline_mode = #tpu.pipeline_mode<synchronous>, transform_indices = @transform_2, window_bounds = array<i64: 64, 1>}, {transform_indices = @transform_3, window_bounds = array<i64: 2, 32, 64>}]} {
    %c0 = arith.constant 0 : index
    %c0_0 = arith.constant 0 : index
    %0 = vector.load %arg2[%c0, %c0_0] : memref<64x720xf32, #tpu.memory_space<vmem>>, vector<64x720xf32>
    %c0_1 = arith.constant 0 : index
    %c0_2 = arith.constant 0 : index
    %1 = vector.load %arg3[%c0_1, %c0_2] : memref<64x1xf32, #tpu.memory_space<vmem>>, vector<64x1xf32>
    %c0_3 = arith.constant 0 : index
    %c0_4 = arith.constant 0 : index
    %c0_5 = arith.constant 0 : index
    %2 = vector.load %arg1[%c0_3, %c0_4, %c0_5] : memref<2x720x64xf32, #tpu.memory_space<vmem>>, vector<1x720x64xf32>
    %3 = vector.shape_cast %2 : vector<1x720x64xf32> to vector<720x64xf32>
    %cst = arith.constant dense<0.000000e+00> : vector<64x64xf32>
    %4 = tpu.matmul %0, %3, %cst {dimension_numbers = #tpu.dot_dimension_numbers<[1], [0], [0], [1], [0, 0, 1, 1], [], []>} : vector<64x720xf32>, vector<720x64xf32>, vector<64x64xf32> -> vector<64x64xf32>
    %5 = vector.broadcast %1 : vector<64x1xf32> to vector<64x64xf32>
    %6 = arith.addf %4, %5 : vector<64x64xf32>
    %7 = vector.extract_strided_slice %6 {offsets = [0, 0], sizes = [32, 64], strides = [1, 1]} : vector<64x64xf32> to vector<32x64xf32>
    %8 = vector.extract_strided_slice %6 {offsets = [32, 0], sizes = [32, 64], strides = [1, 1]} : vector<64x64xf32> to vector<32x64xf32>
    %9 = arith.negf %8 : vector<32x64xf32>
    %10 = math.exp %9 : vector<32x64xf32>
    %cst_6 = arith.constant 1.000000e+00 : f32
    %11 = vector.broadcast %cst_6 : f32 to vector<32x64xf32>
    %12 = arith.addf %11, %10 : vector<32x64xf32>
    %13 = arith.divf %11, %12 : vector<32x64xf32>
    %14 = arith.mulf %7, %13 : vector<32x64xf32>
    %c0_7 = arith.constant 0 : index
    %c0_8 = arith.constant 0 : index
    %c0_9 = arith.constant 0 : index
    %15 = vector.load %arg4[%c0_7, %c0_8, %c0_9] : memref<2x32x64xf32, #tpu.memory_space<vmem>>, vector<1x32x64xf32>
    %16 = vector.shape_cast %15 : vector<1x32x64xf32> to vector<32x64xf32>
    %17 = vector.shape_cast %14 : vector<32x64xf32> to vector<1x32x64xf32>
    tpu.vector_store %arg4[%c0_7, %c0_8, %c0_9], %17 {strides = array<i32>} : memref<2x32x64xf32, #tpu.memory_space<vmem>>, vector<1x32x64xf32>,
    %c1 = arith.constant 1 : index
    %c0_10 = arith.constant 0 : index
    %c0_11 = arith.constant 0 : index
    %18 = vector.load %arg1[%c1, %c0_10, %c0_11] : memref<2x720x64xf32, #tpu.memory_space<vmem>>, vector<1x720x64xf32>
    %19 = vector.shape_cast %18 : vector<1x720x64xf32> to vector<720x64xf32>
    %cst_12 = arith.constant dense<0.000000e+00> : vector<64x64xf32>
    %20 = tpu.matmul %0, %19, %cst_12 {dimension_numbers = #tpu.dot_dimension_numbers<[1], [0], [0], [1], [0, 0, 1, 1], [], []>} : vector<64x720xf32>, vector<720x64xf32>, vector<64x64xf32> -> vector<64x64xf32>
    %21 = vector.broadcast %1 : vector<64x1xf32> to vector<64x64xf32>
    %22 = arith.addf %20, %21 : vector<64x64xf32>
    %23 = vector.extract_strided_slice %22 {offsets = [0, 0], sizes = [32, 64], strides = [1, 1]} : vector<64x64xf32> to vector<32x64xf32>
    %24 = vector.extract_strided_slice %22 {offsets = [32, 0], sizes = [32, 64], strides = [1, 1]} : vector<64x64xf32> to vector<32x64xf32>
    %25 = arith.negf %24 : vector<32x64xf32>
    %26 = math.exp %25 : vector<32x64xf32>
    %cst_13 = arith.constant 1.000000e+00 : f32
    %27 = vector.broadcast %cst_13 : f32 to vector<32x64xf32>
    %28 = arith.addf %27, %26 : vector<32x64xf32>
    %29 = arith.divf %27, %28 : vector<32x64xf32>
    %30 = arith.mulf %23, %29 : vector<32x64xf32>
    %c1_14 = arith.constant 1 : index
    %c0_15 = arith.constant 0 : index
    %c0_16 = arith.constant 0 : index
    %31 = vector.load %arg4[%c1_14, %c0_15, %c0_16] : memref<2x32x64xf32, #tpu.memory_space<vmem>>, vector<1x32x64xf32>
    %32 = vector.shape_cast %31 : vector<1x32x64xf32> to vector<32x64xf32>
    %33 = vector.shape_cast %30 : vector<32x64xf32> to vector<1x32x64xf32>
    tpu.vector_store %arg4[%c1_14, %c0_15, %c0_16], %33 {strides = array<i32>} : memref<2x32x64xf32, #tpu.memory_space<vmem>>, vector<1x32x64xf32>,
    return
  }
  func.func @transform_0(%arg0: i32) -> (i32, i32, i32) {
    %c0_i32 = arith.constant 0 : i32
    %c0_i32_0 = arith.constant 0 : i32
    %c0_i32_1 = arith.constant 0 : i32
    return %arg0, %c0_i32, %c0_i32_0 : i32, i32, i32
  }
  func.func @transform_1(%arg0: i32) -> (i32, i32) {
    %c0_i32 = arith.constant 0 : i32
    %c0_i32_0 = arith.constant 0 : i32
    %c0_i32_1 = arith.constant 0 : i32
    return %c0_i32, %c0_i32_0 : i32, i32
  }
  func.func @transform_2(%arg0: i32) -> (i32, i32) {
    %c0_i32 = arith.constant 0 : i32
    %c0_i32_0 = arith.constant 0 : i32
    %c0_i32_1 = arith.constant 0 : i32
    return %c0_i32, %c0_i32_0 : i32, i32
  }
  func.func @transform_3(%arg0: i32) -> (i32, i32, i32) {
    %c0_i32 = arith.constant 0 : i32
    %c0_i32_0 = arith.constant 0 : i32
    %c0_i32_1 = arith.constant 0 : i32
    return %arg0, %c0_i32, %c0_i32_0 : i32, i32, i32
  }
}

</mosaic_0001>

<bundles_post_ra>
// kernel: _swem_forward.2
= control target key start
LH: loop header
LB: loop body
LE: loop exit
PB: predicated region body
PF: predicated region fallthrough
CT: control target
= control target key end

     0   :  { %s899_s15 = smov 0   ;;  %s901_s16 = smov 0   ;;  %s974_s0 = inlined_call_operand.vmem [shape: f32[1,2,16,32], index: 0, kind: input, shape index: {}]   ;;  %s975_s1 = inlined_call_operand.vmem [shape: f32[1,16,64], index: 1, kind: input, shape index: {}]   ;;  %s976_s2 = inlined_call_operand.vmem [shape: f32[1,2,32,32], index: 2, kind: input, shape index: {}]   ;;  %s977_s3 = inlined_call_operand.vmem [shape: f32[1,2,32,64], index: 3, kind: output, shape index: {0}]   ;;  %s978_s4 = inlined_call_operand.vmem [shape: bf16[1,2,32,64], index: 4, kind: output, shape index: {1}]  }
   0x1   :  { %s903_s17 = smov 0  }
   0x2 LB: > { %s30_s18 = sadd.s32 1, %s868_s16  ;;  %p782_p0 = scmp.ge.s32.totalorder %s872_s17, 1  ;;  %s872_s17 = sphi %s903_s17, %s15_s17   ;;  %s868_s16 = sphi %s901_s16, %s980_s16   ;;  %s864_s15 = sphi %s899_s15, %s979_s15  }
   0x3   : > { %p32_p1 = scmp.ge.s32.totalorder %s30_s18, 2  ;;  %p229_p2 = scmp.lt.s32.totalorder %s872_s17, 3 }
   0x5   : > { %s982_s18 = smov (%p32_p1, %s30_s18), 0  ;;  %p230_p3 = pnand %p782_p0, %p229_p2 }
   0x6   : > { %p297_p4 = scmp.lt.s32.totalorder (!%p230_p3), %s864_s15, 1 }
   0x7   : > { %233 = sbr.rel (%p230_p3) target bundleno = 601 (0x259), region = 32 }
   0xc   : > { %s984_s15 = smov (!%p297_p4, %s864_s15), 1  ;;  %vm349_vm0 = vcmask 261120   ;;  %v389_v21 = vld [vmem:[%s975_s1 + $0x8] sm:$0xff]  ;;  %v388_v22 = vld [vmem:[%s975_s1] sm:$0xff]  ;;  %vm422_vm7 = vcmask 130048   ;;  %vm464_vm8 = vcmask 523264  }
   0xd   : > { %s801_s19 = sshll.u32 %s984_s15, 4  ;;  %449 = vmatpush.msra.mxu0 %v389_v21  ;;  %805 = vmatpush.msra.mxu3 %v389_v21  ;;  %vm512_vm9 = vcmask 519168   ;;  %s802_s30 = sshll.u32 %s984_s15, 5 }
   0xe   : > { %s303_s22 = scalar_lea.vmem %s974_s0, %s801_s19  ;;  %s344_s29 = scalar_lea.vmem %s978_s4, %s801_s19 }
   0xf   : > { %v345_v0 = vld [vmem:[%s303_s22] sm:$0xff]  ;;  %v346_v1 = vld [vmem:[%s303_s22 + $0x8] sm:$0xff]  ;;  %450 = vmatpush.msra.mxu0 %v388_v22  ;;  %806 = vmatpush.msra.mxu3 %v388_v22  ;;  %s320_s7 = scalar_lea.vmem %s976_s2, %s802_s30  ;;  %s332_s10 = scalar_lea.vmem %s977_s3, %s802_s30 }
  0x10   : > { %v347_v2 = vmul.f32 %v345_v0, %v345_v0  ;;  %v348_v3 = vmul.f32 %v346_v1, %v346_v1 }
  0x12   : > { %v350_v4 = vsel %vm349_vm0, %v347_v2, 0.0  ;;  %v351_v5 = vsel %vm349_vm0, %v348_v3, 0.0 }
  0x13   : > { %v352_v6 = vadd.f32 %v351_v5, %v350_v4 }
  0x15   : > { %v353_v7 = vrot.slane %v352_v6, 4 }
  0x17   : > { %v354_v8 = vadd.f32 %v353_v7, %v352_v6 }
  0x19   : > { %v355_v9 = vrot.slane %v354_v8, 2 }
  0x1b   : > { %v356_v10 = vadd.f32 %v355_v9, %v354_v8 }
  0x1d   : > { %v357_v11 = vrot.slane %v356_v10, 1 }
  0x1f   : > { %v358_v12 = vadd.f32 %v357_v11, %v356_v10 }
  0x21   : > { %836 = vrsqrt.f32 %v358_v12  ;;  %vm366_vm1 = vcmp.eq.f32.partialorder %v358_v12, inf  ;;  %v369_v19 = vand.u32 2147483648, %v358_v12  ;;  %vm368_vm2 = vcmp.eq.f32.partialorder %v358_v12, 0.0 }
  0x27   : > { %v837_v13 = vpop.eup %836 }
  0x28   : > { %v360_v14 = vmul.f32 %v837_v13, %v358_v12 }
  0x2a   : > { %v361_v15 = vmul.f32 %v837_v13, %v360_v14 }
  0x2c   : > { %v362_v16 = vmul.f32 0.5, %v361_v15 }
  0x2e   : > { %v363_v17 = vsub.f32 1.5, %v362_v16 }
  0x30   : > { %v364_v18 = vmul.f32 %v837_v13, %v363_v17 }
  0x32   : > { %v365_v20 = vmul.f32 %v364_v18, %v358_v12 }
  0x34   : > { %v367_v23 = vsel %vm366_vm1, %v358_v12, %v365_v20 }
  0x35   : > { %v370_v24 = vsel %vm368_vm2, %v369_v19, %v367_v23 }
  0x36   : > { %v371_v25 = vadd.f32 1e-06, %v370_v24 }
  0x38   : > { %838 = vrcp.f32 %v371_v25  ;;  %v383_v28 = vand.u32 2147483648, %v371_v25  ;;  %vm377_vm3 = vweird.f32 %v371_v25  ;;  %v381_v30 = vand.u32 2147483647, %v371_v25 }
  0x3a   : > { %v384_v32 = vor.u32 1.1754944e-38, %v383_v28  ;;  %vm382_vm6 = vcmp.eq.f32.partialorder %v381_v30, 8.507059e+37  ;;  %v517_v30 = vld [vmem:[%s320_s7] sm:$0xff] }
  0x3e   : > { %v839_v26 = vpop.eup %838 }
  0x3f   : > { %v373_v27 = vmul.f32 %v839_v26, %v371_v25  ;;  %vm378_vm4 = vweird.f32 %v839_v26 }
  0x40   : > { %vm379_vm5 = vmor %vm377_vm3, %vm378_vm4 }
  0x41   : > { %v374_v29 = vsub.f32 1.0, %v373_v27 }
  0x43   : > { %v375_v31 = vmul.f32 %v839_v26, %v374_v29  ;;  %v519_v29 = vld [vmem:[%s320_s7 + $0x10] sm:$0xff] }
  0x45   : > { %v376_v33 = vadd.f32 %v839_v26, %v375_v31  ;;  %v520_v31 = vld [vmem:[%s320_s7 + $0x18] sm:$0xff] }
  0x47   : > { %v380_v34 = vsel %vm379_vm5, %v839_v26, %v376_v33 }
  0x48   : > { %v385_v35 = vsel %vm382_vm6, %v384_v32, %v380_v34  ;;  %v518_v32 = vld [vmem:[%s320_s7 + $0x8] sm:$0xff] }
  0x49   : > { %v386_v36 = vmul.f32 %v385_v35, %v345_v0  ;;  %v387_v37 = vmul.f32 %v385_v35, %v346_v1 }
  0x4b   : > { %390 = vxpose.xlu0.b32.start [1/2] (short) (narrow) %v386_v36, 32 }
  0x53   : > { %391 = vxpose.xlu0.b32.end [2/2] (short) (narrow) %v387_v37, 32 }
  0xef   : > { %v406_v38 = vpop.trf.xlu0 }
  0xf0   : > { %791 = vmatmul.msk.f32.vlgmr.msra.gmra.mxu0 %vm422_vm7, %v406_v38 }
  0xf7   : > { %v407_v39 = vpop.trf.xlu0 }
  0xf8   : > { %792 = vmatmul.msk.f32.vlgmr.msra.gmra.mxu3 %vm422_vm7, %v407_v39 }
  0xff   : > { %v408_v40 = vpop.trf.xlu0 }
 0x100   : > { %793 = vmatmul.msk.f32.gmra.mxu3 %vm422_vm7, %v408_v40 }
 0x107   : > { %v409_v41 = vpop.trf.xlu0 }
 0x108   : > { %794 = vmatmul.msk.f32.gmra.mxu3 %vm422_vm7, %v409_v41 }
 0x16d   : > { %v452_v44 = vpop.f32.mrf.mxu0 }
 0x16e   : > { %v465_v47 = vsel %vm464_vm8, %v452_v44, -inf }
 0x17b   : > { %v455_v42 = vpop.f32.mrf.mxu3 }
 0x17c   : > { %v466_v45 = vsel %vm464_vm8, %v455_v42, -inf }
 0x17d   : > { %v469_v50 = vmax.f32 %v465_v47, %v466_v45 }
 0x183   : > { %v458_v43 = vpop.f32.mrf.mxu3 }
 0x184   : > { %v467_v48 = vsel %vm464_vm8, %v458_v43, -inf }
 0x18b   : > { %v461_v46 = vpop.f32.mrf.mxu3 }
 0x18c   : > { %v468_v49 = vsel %vm464_vm8, %v461_v46, -inf }
 0x18d   : > { %v470_v51 = vmax.f32 %v467_v48, %v468_v49 }
 0x18f   : > { %v471_v52 = vmax.f32 %v469_v50, %v470_v51 }
 0x191   : > { %v472_v53 = vrot.slane %v471_v52, 4 }
 0x193   : > { %v473_v54 = vmax.f32 %v471_v52, %v472_v53 }
 0x195   : > { %v474_v55 = vrot.slane %v473_v54, 2 }
 0x197   : > { %v475_v56 = vmax.f32 %v473_v54, %v474_v55 }
 0x199   : > { %v476_v57 = vrot.slane %v475_v56, 1 }
 0x19b   : > { %v477_v58 = vmax.f32 %v475_v56, %v476_v57 }
 0x19d   : > { %v478_v59 = vsub.f32 %v452_v44, %v477_v58  ;;  %v479_v60 = vsub.f32 %v455_v42, %v477_v58  ;;  %v480_v61 = vsub.f32 %v458_v43, %v477_v58  ;;  %v481_v62 = vsub.f32 %v461_v46, %v477_v58 }
 0x19f   : > { %v482_v63 = vmul.f32 1.442695, %v478_v59  ;;  %v484_v0 = vmul.f32 1.442695, %v479_v60  ;;  %v486_v1 = vmul.f32 1.442695, %v480_v61 }
 0x1a0   : > { %v488_v2 = vmul.f32 1.442695, %v481_v62 }
 0x1a1   : > { %840 = vpow2.f32 %v482_v63 }
 0x1a2   : > { %842 = vpow2.f32 %v484_v0 }
 0x1a3   : > { %844 = vpow2.f32 %v486_v1 }
 0x1a4   : > { %846 = vpow2.f32 %v488_v2 }
 0x1a7   : > { %v841_v3 = vpop.eup %840 }
 0x1a8   : > { %v843_v4 = vpop.eup %842  ;;  %v490_v5 = vsel %vm464_vm8, %v841_v3, 0.0  ;;  %v508_v6 = vpack.c.bf16 %v841_v3, %v841_v3 }
 0x1a9   : > { %v845_v7 = vpop.eup %844  ;;  %v491_v8 = vsel %vm464_vm8, %v843_v4, 0.0  ;;  %v509_v9 = vpack.c.bf16 %v843_v4, %v843_v4 }
 0x1aa   : > { %v847_v10 = vpop.eup %846  ;;  %v492_v11 = vadd.f32 %v491_v8, %v490_v5  ;;  %v510_v12 = vpack.c.bf16 %v845_v7, %v845_v7  ;;  %513 = vst.msk [vmem:[%s344_s29] sm:$0xf] %vm512_vm9, %v508_v6  ;;  %v493_v13 = vsel %vm464_vm8, %v845_v7, 0.0 }
 0x1ab   : > { %v511_v14 = vpack.c.bf16 %v847_v10, %v847_v10  ;;  %514 = vst.msk [vmem:[%s344_s29 + $0x4] sm:$0xf] %vm512_vm9, %v509_v9  ;;  %v495_v16 = vsel %vm464_vm8, %v847_v10, 0.0 }
 0x1ac   : > { %v494_v15 = vadd.f32 %v493_v13, %v492_v11  ;;  %515 = vst.msk [vmem:[%s344_s29 + $0x8] sm:$0xf] %vm512_vm9, %v510_v12 }
 0x1ad   : > { %516 = vst.msk [vmem:[%s344_s29 + $0xc] sm:$0xf] %vm512_vm9, %v511_v14 }
 0x1ae   : > { %v496_v17 = vadd.f32 %v495_v16, %v494_v15 }
 0x1b0   : > { %v497_v18 = vrot.slane %v496_v17, 4 }
 0x1b2   : > { %v498_v19 = vadd.f32 %v497_v18, %v496_v17 }
 0x1b4   : > { %v499_v20 = vrot.slane %v498_v19, 2 }
 0x1b6   : > { %v500_v21 = vadd.f32 %v499_v20, %v498_v19 }
 0x1b8   : > { %v501_v22 = vrot.slane %v500_v21, 1 }
 0x1ba   : > { %v502_v23 = vadd.f32 %v501_v22, %v500_v21 }
 0x1bc   : > { %848 = vrcp.f32 %v502_v23 }
 0x1c2   : > { %v849_v24 = vpop.eup %848 }
 0x1c3   : > { %v507_v25 = vmul.f32 %v849_v24, %v847_v10  ;;  %v506_v26 = vmul.f32 %v849_v24, %v845_v7  ;;  %v505_v27 = vmul.f32 %v849_v24, %v843_v4  ;;  %v504_v28 = vmul.f32 %v849_v24, %v841_v3 }
 0x1c5   : > { %545 = vmatpush.msra.mxu1 %v507_v25  ;;  %807 = vmatpush.msra.mxu2 %v507_v25 }
 0x1c7   : > { %546 = vmatpush.msra.mxu1 %v506_v26  ;;  %808 = vmatpush.msra.mxu2 %v506_v26 }
 0x1c9   : > { %547 = vmatpush.msra.mxu1 %v505_v27  ;;  %809 = vmatpush.msra.mxu2 %v505_v27 }
 0x1cb   : > { %548 = vmatpush.msra.mxu1 %v504_v28  ;;  %810 = vmatpush.msra.mxu2 %v504_v28 }
 0x1cc   : > { %797 = vmatmul.msk.f32.vlgmr.msra.gmra.mxu2 %vm349_vm0, %v519_v29  ;;  %795 = vmatmul.msk.f32.vlgmr.msra.gmra.mxu1 %vm349_vm0, %v517_v30 }
 0x1d4   : > { %798 = vmatmul.msk.f32.gmra.mxu2 %vm349_vm0, %v520_v31  ;;  %796 = vmatmul.msk.f32.gmra.mxu1 %vm349_vm0, %v518_v32 }
 0x249   : > { %v550_v33 = vpop.f32.mrf.mxu1 }
 0x24a   : > { %562 = vst.msk [vmem:[%s332_s10] sm:$0xff] %vm464_vm8, %v550_v33 }
 0x24f   : > { %v556_v34 = vpop.f32.mrf.mxu2 }
 0x250   : > { %564 = vst.msk [vmem:[%s332_s10 + $0x10] sm:$0xff] %vm464_vm8, %v556_v34 }
 0x251   : > { %v553_v35 = vpop.f32.mrf.mxu1 }
 0x252   : > { %563 = vst.msk [vmem:[%s332_s10 + $0x8] sm:$0xff] %vm464_vm8, %v553_v35 }
 0x257   : > { %v559_v36 = vpop.f32.mrf.mxu2 }
 0x258   : > { %565 = vst.msk [vmem:[%s332_s10 + $0x18] sm:$0xff] %vm464_vm8, %v559_v36 }
 0x259 PF: > { %s15_s17 = sadd.s32 1, %s872_s17   ;;  %s979_s15 = smov %s868_s16 }
 0x25a   : > { %p12_p5 = scmp.ge.s32.totalorder %s15_s17, 4   ;;  %s980_s16 = smov %s982_s18 }
 0x25c   :  { %14 = sbr.rel (!%p12_p5) target bundleno = 2 (0x2), region = 80 }

// kernel: _swem_forward.3
= control target key start
LH: loop header
LB: loop body
LE: loop exit
PB: predicated region body
PF: predicated region fallthrough
CT: control target
= control target key end

     0   :  { %vm200_vm0 = vcmask 654336   ;;  %vm551_vm5 = vcmask 523264   ;;  %s2263_s0 = inlined_call_operand.vmem [shape: f32[2,720,64], index: 0, kind: input, shape index: {}]   ;;  %s2264_s1 = inlined_call_operand.vmem [shape: f32[64,720], index: 1, kind: input, shape index: {}]   ;;  %s2265_s2 = inlined_call_operand.vmem [shape: f32[64,1], index: 2, kind: input, shape index: {}]   ;;  %s2266_s3 = inlined_call_operand.vmem [shape: f32[2,32,64], index: 3, kind: output, shape index: {}]  }
   0x1   :  { %v85_v0 = vld [vmem:[%s2263_s0 + $0x78] sm:$0xff]  ;;  %v84_v2 = vld [vmem:[%s2263_s0 + $0x70] sm:$0xff]  ;;  %v83_v6 = vld [vmem:[%s2263_s0 + $0x68] sm:$0xff] }
   0x2   :  { %v117_v1 = vld [vmem:[%s2263_s0 + $0x178] sm:$0xff]  ;;  %225 = vmatpush.msra.mxu0 %v85_v0  ;;  %v116_v4 = vld [vmem:[%s2263_s0 + $0x170] sm:$0xff]  ;;  %v115_v8 = vld [vmem:[%s2263_s0 + $0x168] sm:$0xff] }
   0x3   :  { %307 = vmatpush.msra.mxu2 %v117_v1  ;;  %v101_v3 = vld [vmem:[%s2263_s0 + $0xf8] sm:$0xff]  ;;  %v100_v7 = vld [vmem:[%s2263_s0 + $0xf0] sm:$0xff]  ;;  %v99_v10 = vld [vmem:[%s2263_s0 + $0xe8] sm:$0xff] }
   0x4   :  { %v133_v5 = vld [vmem:[%s2263_s0 + $0x1f8] sm:$0xff]  ;;  %266 = vmatpush.msra.mxu1 %v101_v3  ;;  %226 = vmatpush.msra.mxu0 %v84_v2  ;;  %v132_v9 = vld [vmem:[%s2263_s0 + $0x1f0] sm:$0xff]  ;;  %v82_v11 = vld [vmem:[%s2263_s0 + $0x60] sm:$0xff] }
   0x5   :  { %348 = vmatpush.msra.mxu3 %v133_v5  ;;  %308 = vmatpush.msra.mxu2 %v116_v4  ;;  %v114_v12 = vld [vmem:[%s2263_s0 + $0x160] sm:$0xff]  ;;  %v131_v13 = vld [vmem:[%s2263_s0 + $0x1e8] sm:$0xff]  ;;  %v81_v16 = vld [vmem:[%s2263_s0 + $0x58] sm:$0xff] }
   0x6   :  { %267 = vmatpush.msra.mxu1 %v100_v7  ;;  %227 = vmatpush.msra.mxu0 %v83_v6  ;;  %v98_v14 = vld [vmem:[%s2263_s0 + $0xe0] sm:$0xff]  ;;  %v113_v17 = vld [vmem:[%s2263_s0 + $0x158] sm:$0xff]  ;;  %v80_v20 = vld [vmem:[%s2263_s0 + $0x50] sm:$0xff] }
   0x7   :  { %349 = vmatpush.msra.mxu3 %v132_v9  ;;  %309 = vmatpush.msra.mxu2 %v115_v8  ;;  %v130_v15 = vld [vmem:[%s2263_s0 + $0x1e0] sm:$0xff]  ;;  %v97_v18 = vld [vmem:[%s2263_s0 + $0xd8] sm:$0xff]  ;;  %v112_v21 = vld [vmem:[%s2263_s0 + $0x150] sm:$0xff] }
   0x8   :  { %268 = vmatpush.msra.mxu1 %v99_v10  ;;  %228 = vmatpush.msra.mxu0 %v82_v11  ;;  %v129_v19 = vld [vmem:[%s2263_s0 + $0x1d8] sm:$0xff]  ;;  %v96_v22 = vld [vmem:[%s2263_s0 + $0xd0] sm:$0xff]  ;;  %v79_v24 = vld [vmem:[%s2263_s0 + $0x48] sm:$0xff] }
   0x9   :  { %350 = vmatpush.msra.mxu3 %v131_v13  ;;  %310 = vmatpush.msra.mxu2 %v114_v12  ;;  %v128_v23 = vld [vmem:[%s2263_s0 + $0x1d0] sm:$0xff]  ;;  %v111_v25 = vld [vmem:[%s2263_s0 + $0x148] sm:$0xff]  ;;  %v78_v28 = vld [vmem:[%s2263_s0 + $0x40] sm:$0xff] }
   0xa   :  { %269 = vmatpush.msra.mxu1 %v98_v14  ;;  %229 = vmatpush.msra.mxu0 %v81_v16  ;;  %v95_v26 = vld [vmem:[%s2263_s0 + $0xc8] sm:$0xff]  ;;  %v110_v29 = vld [vmem:[%s2263_s0 + $0x140] sm:$0xff]  ;;  %v77_v32 = vld [vmem:[%s2263_s0 + $0x38] sm:$0xff] }
   0xb   :  { %351 = vmatpush.msra.mxu3 %v130_v15  ;;  %311 = vmatpush.msra.mxu2 %v113_v17  ;;  %v127_v27 = vld [vmem:[%s2263_s0 + $0x1c8] sm:$0xff]  ;;  %v94_v30 = vld [vmem:[%s2263_s0 + $0xc0] sm:$0xff]  ;;  %v109_v33 = vld [vmem:[%s2263_s0 + $0x138] sm:$0xff] }
   0xc   :  { %270 = vmatpush.msra.mxu1 %v97_v18  ;;  %230 = vmatpush.msra.mxu0 %v80_v20  ;;  %v126_v31 = vld [vmem:[%s2263_s0 + $0x1c0] sm:$0xff]  ;;  %v93_v34 = vld [vmem:[%s2263_s0 + $0xb8] sm:$0xff]  ;;  %v76_v36 = vld [vmem:[%s2263_s0 + $0x30] sm:$0xff] }
   0xd   :  { %352 = vmatpush.msra.mxu3 %v129_v19  ;;  %312 = vmatpush.msra.mxu2 %v112_v21  ;;  %v125_v35 = vld [vmem:[%s2263_s0 + $0x1b8] sm:$0xff]  ;;  %v108_v37 = vld [vmem:[%s2263_s0 + $0x130] sm:$0xff]  ;;  %v75_v40 = vld [vmem:[%s2263_s0 + $0x28] sm:$0xff]  ;;  %v1136_v21 = vmov 0  }
   0xe   :  { %271 = vmatpush.msra.mxu1 %v96_v22  ;;  %231 = vmatpush.msra.mxu0 %v79_v24  ;;  %v92_v38 = vld [vmem:[%s2263_s0 + $0xb0] sm:$0xff]  ;;  %v107_v41 = vld [vmem:[%s2263_s0 + $0x128] sm:$0xff]  ;;  %v74_v44 = vld [vmem:[%s2263_s0 + $0x20] sm:$0xff] }
   0xf   :  { %353 = vmatpush.msra.mxu3 %v128_v23  ;;  %313 = vmatpush.msra.mxu2 %v111_v25  ;;  %v124_v39 = vld [vmem:[%s2263_s0 + $0x1b0] sm:$0xff]  ;;  %v91_v42 = vld [vmem:[%s2263_s0 + $0xa8] sm:$0xff]  ;;  %v106_v45 = vld [vmem:[%s2263_s0 + $0x120] sm:$0xff] }
  0x10   :  { %272 = vmatpush.msra.mxu1 %v95_v26  ;;  %232 = vmatpush.msra.mxu0 %v78_v28  ;;  %v123_v43 = vld [vmem:[%s2263_s0 + $0x1a8] sm:$0xff]  ;;  %v90_v46 = vld [vmem:[%s2263_s0 + $0xa0] sm:$0xff]  ;;  %v73_v48 = vld [vmem:[%s2263_s0 + $0x18] sm:$0xff] }
  0x11   :  { %354 = vmatpush.msra.mxu3 %v127_v27  ;;  %314 = vmatpush.msra.mxu2 %v110_v29  ;;  %v122_v47 = vld [vmem:[%s2263_s0 + $0x1a0] sm:$0xff]  ;;  %v105_v49 = vld [vmem:[%s2263_s0 + $0x118] sm:$0xff]  ;;  %v72_v52 = vld [vmem:[%s2263_s0 + $0x10] sm:$0xff] }
  0x12   :  { %273 = vmatpush.msra.mxu1 %v94_v30  ;;  %233 = vmatpush.msra.mxu0 %v77_v32  ;;  %v89_v50 = vld [vmem:[%s2263_s0 + $0x98] sm:$0xff]  ;;  %v104_v53 = vld [vmem:[%s2263_s0 + $0x110] sm:$0xff]  ;;  %v71_v56 = vld [vmem:[%s2263_s0 + $0x8] sm:$0xff] }
  0x13   :  { %355 = vmatpush.msra.mxu3 %v126_v31  ;;  %315 = vmatpush.msra.mxu2 %v109_v33  ;;  %v121_v51 = vld [vmem:[%s2263_s0 + $0x198] sm:$0xff]  ;;  %v88_v54 = vld [vmem:[%s2263_s0 + $0x90] sm:$0xff]  ;;  %v103_v57 = vld [vmem:[%s2263_s0 + $0x108] sm:$0xff] }
  0x14   :  { %274 = vmatpush.msra.mxu1 %v93_v34  ;;  %234 = vmatpush.msra.mxu0 %v76_v36  ;;  %v120_v55 = vld [vmem:[%s2263_s0 + $0x190] sm:$0xff]  ;;  %v87_v58 = vld [vmem:[%s2263_s0 + $0x88] sm:$0xff]  ;;  %v70_v60 = vld [vmem:[%s2263_s0] sm:$0xff] }
  0x15   :  { %356 = vmatpush.msra.mxu3 %v125_v35  ;;  %316 = vmatpush.msra.mxu2 %v108_v37  ;;  %v119_v59 = vld [vmem:[%s2263_s0 + $0x188] sm:$0xff]  ;;  %v102_v61 = vld [vmem:[%s2263_s0 + $0x100] sm:$0xff]  ;;  %v1351_v63 = vld [vmem:[%s2264_s1 + $0x10] sm:$0xff] }
  0x16   :  { %275 = vmatpush.msra.mxu1 %v92_v38  ;;  %235 = vmatpush.msra.mxu0 %v75_v40  ;;  %v1346_v62 = vld [vmem:[%s2264_s1] sm:$0xff]  ;;  %v1009_v0 = vld [vmem:[%s2263_s0 + $0x348] sm:$0xff]  ;;  %v1372_v4 = vld [vmem:[%s2264_s1 + $0x18] sm:$0xff] }
  0x17   :  { %357 = vmatpush.msra.mxu3 %v124_v39  ;;  %317 = vmatpush.msra.mxu2 %v107_v41  ;;  %v86_v1 = vld [vmem:[%s2263_s0 + $0x80] sm:$0xff]  ;;  %v1365_v3 = vld [vmem:[%s2264_s1 + $0x8] sm:$0xff]  ;;  %v149_v5 = vld [vmem:[%s2263_s0 + $0x278] sm:$0xff] }
  0x18   :  { %276 = vmatpush.msra.mxu1 %v91_v42  ;;  %236 = vmatpush.msra.mxu0 %v74_v44  ;;  %v118_v2 = vld [vmem:[%s2263_s0 + $0x180] sm:$0xff]  ;;  %v1025_v6 = vld [vmem:[%s2263_s0 + $0x3c8] sm:$0xff]  ;;  %v148_v9 = vld [vmem:[%s2263_s0 + $0x270] sm:$0xff] }
  0x19   :  { %358 = vmatpush.msra.mxu3 %v123_v43  ;;  %318 = vmatpush.msra.mxu2 %v106_v45  ;;  %v159_v7 = vld [vmem:[%s2263_s0 + $0x2c8] sm:$0xff]  ;;  %v1008_v8 = vld [vmem:[%s2263_s0 + $0x340] sm:$0xff]  ;;  %v1007_v12 = vld [vmem:[%s2263_s0 + $0x338] sm:$0xff] }
  0x1a   :  { %277 = vmatpush.msra.mxu1 %v90_v46  ;;  %237 = vmatpush.msra.mxu0 %v73_v48  ;;  %v1024_v10 = vld [vmem:[%s2263_s0 + $0x3c0] sm:$0xff]  ;;  %v147_v13 = vld [vmem:[%s2263_s0 + $0x268] sm:$0xff]  ;;  %v1406_v14 = vld [vmem:[%s2264_s1 + $0x30] sm:$0xff] }
  0x1b   :  { %359 = vmatpush.msra.mxu3 %v122_v47  ;;  %319 = vmatpush.msra.mxu2 %v105_v49  ;;  %v158_v11 = vld [vmem:[%s2263_s0 + $0x2c0] sm:$0xff]  ;;  %v1023_v16 = vld [vmem:[%s2263_s0 + $0x3b8] sm:$0xff]  ;;  %v1006_v18 = vld [vmem:[%s2263_s0 + $0x330] sm:$0xff] }
  0x1c   :  { %278 = vmatpush.msra.mxu1 %v89_v50  ;;  %238 = vmatpush.msra.mxu0 %v72_v52  ;;  %v1411_v15 = vld [vmem:[%s2264_s1 + $0x40] sm:$0xff]  ;;  %v1419_v17 = vld [vmem:[%s2264_s1 + $0x38] sm:$0xff]  ;;  %v1429_v19 = vld [vmem:[%s2264_s1 + $0x48] sm:$0xff] }
  0x1d   :  { %360 = vmatpush.msra.mxu3 %v121_v51  ;;  %320 = vmatpush.msra.mxu2 %v104_v53  ;;  %v66_v20 = vld [vmem:[%s2265_s2 + $0x20] sm:$0xff]  ;;  %v1022_v23 = vld [vmem:[%s2263_s0 + $0x3b0] sm:$0xff]  ;;  %v1005_v24 = vld [vmem:[%s2263_s0 + $0x328] sm:$0xff] }
  0x1e   :  { %279 = vmatpush.msra.mxu1 %v88_v54  ;;  %239 = vmatpush.msra.mxu0 %v71_v56  ;;  %v146_v22 = vld [vmem:[%s2263_s0 + $0x260] sm:$0xff]  ;;  %v157_v25 = vld [vmem:[%s2263_s0 + $0x2b8] sm:$0xff]  ;;  %v1021_v27 = vld [vmem:[%s2263_s0 + $0x3a8] sm:$0xff] }
  0x1f   :  { %361 = vmatpush.msra.mxu3 %v120_v55  ;;  %321 = vmatpush.msra.mxu2 %v103_v57  ;;  %v145_v26 = vld [vmem:[%s2263_s0 + $0x258] sm:$0xff]  ;;  %v1004_v28 = vld [vmem:[%s2263_s0 + $0x320] sm:$0xff]  ;;  %v1466_v30 = vld [vmem:[%s2264_s1 + $0x70] sm:$0xff] }
  0x20   :  { %280 = vmatpush.msra.mxu1 %v87_v58  ;;  %240 = vmatpush.msra.mxu0 %v70_v60  ;;  %v1461_v29 = vld [vmem:[%s2264_s1 + $0x60] sm:$0xff]  ;;  %v68_v31 = vld [vmem:[%s2265_s2 + $0x30] sm:$0xff]  ;;  %v1477_v33 = vld [vmem:[%s2264_s1 + $0x68] sm:$0xff] }
  0x21   :  { %362 = vmatpush.msra.mxu3 %v119_v59  ;;  %322 = vmatpush.msra.mxu2 %v102_v61  ;;  %v144_v32 = vld [vmem:[%s2263_s0 + $0x250] sm:$0xff]  ;;  %v1020_v34 = vld [vmem:[%s2263_s0 + $0x3a0] sm:$0xff]  ;;  %v1488_v35 = vld [vmem:[%s2264_s1 + $0x78] sm:$0xff] }
  0x22   :  { %241 = vmatmul.f32.vlgmr.msra.gmra.mxu0 %v1346_v62  ;;  %323 = vmatmul.f32.vlgmr.msra.gmra.mxu2 %v1351_v63  ;;  %v67_v36 = vld [vmem:[%s2265_s2 + $0x28] sm:$0xff]  ;;  %v156_v37 = vld [vmem:[%s2263_s0 + $0x2b0] sm:$0xff]  ;;  %v1003_v38 = vld [vmem:[%s2263_s0 + $0x318] sm:$0xff] }
  0x23   :  { %647 = vmatpush.msrb.mxu2 %v1009_v0  ;;  %281 = vmatpush.msra.mxu1 %v86_v1  ;;  %v143_v39 = vld [vmem:[%s2263_s0 + $0x248] sm:$0xff]  ;;  %v1019_v40 = vld [vmem:[%s2263_s0 + $0x398] sm:$0xff]  ;;  %v1002_v41 = vld [vmem:[%s2263_s0 + $0x310] sm:$0xff] }
  0x24   :  { %363 = vmatpush.msra.mxu3 %v118_v2  ;;  %282 = vmatmul.f32.vlgmr.msra.gmra.mxu1 %v1365_v3  ;;  %v155_v42 = vld [vmem:[%s2263_s0 + $0x2a8] sm:$0xff]  ;;  %v142_v43 = vld [vmem:[%s2263_s0 + $0x240] sm:$0xff]  ;;  %v1018_v44 = vld [vmem:[%s2263_s0 + $0x390] sm:$0xff] }
  0x25   :  { %364 = vmatmul.f32.vlgmr.msra.gmra.mxu3 %v1372_v4  ;;  %389 = vmatpush.msrb.mxu0 %v149_v5  ;;  %v1522_v45 = vld [vmem:[%s2264_s1 + $0x90] sm:$0xff]  ;;  %v1527_v46 = vld [vmem:[%s2264_s1 + $0xa0] sm:$0xff]  ;;  %v69_v47 = vld [vmem:[%s2265_s2 + $0x38] sm:$0xff] }
  0x26   :  { %688 = vmatpush.msrb.mxu3 %v1025_v6  ;;  %436 = vmatpush.msrb.mxu1 %v159_v7  ;;  %v1001_v48 = vld [vmem:[%s2263_s0 + $0x308] sm:$0xff]  ;;  %v1538_v49 = vld [vmem:[%s2264_s1 + $0x98] sm:$0xff]  ;;  %v64_v52 = vld [vmem:[%s2265_s2 + $0x10] sm:$0xff] }
  0x27   :  { %648 = vmatpush.msrb.mxu2 %v1008_v8  ;;  %390 = vmatpush.msrb.mxu0 %v148_v9  ;;  %v141_v50 = vld [vmem:[%s2263_s0 + $0x238] sm:$0xff]  ;;  %v1548_v51 = vld [vmem:[%s2264_s1 + $0xa8] sm:$0xff]  ;;  %v154_v54 = vld [vmem:[%s2263_s0 + $0x2a0] sm:$0xff] }
  0x28   :  { %689 = vmatpush.msrb.mxu3 %v1024_v10  ;;  %437 = vmatpush.msrb.mxu1 %v158_v11  ;;  %v1017_v53 = vld [vmem:[%s2263_s0 + $0x388] sm:$0xff]  ;;  %v1000_v55 = vld [vmem:[%s2263_s0 + $0x300] sm:$0xff]  ;;  %v140_v57 = vld [vmem:[%s2263_s0 + $0x230] sm:$0xff] }
  0x29   :  { %649 = vmatpush.msrb.mxu2 %v1007_v12  ;;  %391 = vmatpush.msrb.mxu0 %v147_v13  ;;  %v62_v56 = vld [vmem:[%s2265_s2] sm:$0xff]  ;;  %v999_v59 = vld [vmem:[%s2263_s0 + $0x2f8] sm:$0xff]  ;;  %v1585_v61 = vld [vmem:[%s2264_s1 + $0xd0] sm:$0xff] }
  0x2a   :  { %244 = vmatmul.f32.gmra.mxu0 %v1406_v14  ;;  %326 = vmatmul.f32.gmra.mxu2 %v1411_v15  ;;  %v1016_v58 = vld [vmem:[%s2263_s0 + $0x380] sm:$0xff]  ;;  %v65_v0 = vld [vmem:[%s2265_s2 + $0x18] sm:$0xff]  ;;  %v139_v1 = vld [vmem:[%s2263_s0 + $0x228] sm:$0xff] }
  0x2b   :  { %690 = vmatpush.msrb.mxu3 %v1023_v16  ;;  %1101 = vset.pattern.permute.xlu0 %v1136_v21  ;;  %v1580_v60 = vld [vmem:[%s2264_s1 + $0xc0] sm:$0xff]  ;;  %v1596_v2 = vld [vmem:[%s2264_s1 + $0xc8] sm:$0xff]  ;;  %v1015_v5 = vld [vmem:[%s2263_s0 + $0x378] sm:$0xff] }
  0x2c   :  { %285 = vmatmul.f32.gmra.mxu1 %v1419_v17  ;;  %650 = vmatpush.msrb.mxu2 %v1006_v18  ;;  %v1606_v6 = vld [vmem:[%s2264_s1 + $0xd8] sm:$0xff]  ;;  %v998_v8 = vld [vmem:[%s2263_s0 + $0x2f0] sm:$0xff]  ;;  %v138_v9 = vld [vmem:[%s2263_s0 + $0x220] sm:$0xff] }
  0x2d   :  { %367 = vmatmul.f32.gmra.mxu3 %v1429_v19  ;;  %182 = vperm.xlu0 %1101, %v66_v20   ;;  %v153_v7 = vld [vmem:[%s2263_s0 + $0x298] sm:$0xff]  ;;  %v1014_v10 = vld [vmem:[%s2263_s0 + $0x370] sm:$0xff]  ;;  %v63_v12 = vld [vmem:[%s2265_s2 + $0x8] sm:$0xff] }
  0x2e   :  { %392 = vmatpush.msrb.mxu0 %v146_v22  ;;  %691 = vmatpush.msrb.mxu3 %v1022_v23  ;;  %v152_v11 = vld [vmem:[%s2263_s0 + $0x290] sm:$0xff]  ;;  %v997_v13 = vld [vmem:[%s2263_s0 + $0x2e8] sm:$0xff]  ;;  %v137_v16 = vld [vmem:[%s2263_s0 + $0x218] sm:$0xff] }
  0x2f   :  { %651 = vmatpush.msrb.mxu2 %v1005_v24  ;;  %438 = vmatpush.msrb.mxu1 %v157_v25  ;;  %v1013_v18 = vld [vmem:[%s2263_s0 + $0x368] sm:$0xff]  ;;  %v1640_v20 = vld [vmem:[%s2264_s1 + $0xf0] sm:$0xff]  ;;  %v996_v22 = vld [vmem:[%s2263_s0 + $0x2e0] sm:$0xff] }
  0x30   :  { %393 = vmatpush.msrb.mxu0 %v145_v26  ;;  %692 = vmatpush.msrb.mxu3 %v1021_v27  ;;  %v136_v23 = vld [vmem:[%s2263_s0 + $0x210] sm:$0xff]  ;;  %v1656_v24 = vld [vmem:[%s2264_s1 + $0xf8] sm:$0xff]  ;;  %v1012_v25 = vld [vmem:[%s2263_s0 + $0x360] sm:$0xff] }
  0x31   :  { %1102 = vset.pattern.permute.xlu1 %v1136_v21  ;;  %652 = vmatpush.msrb.mxu2 %v1004_v28  ;;  %v1666_v26 = vld [vmem:[%s2264_s1 + $0x108] sm:$0xff]  ;;  %v995_v28 = vld [vmem:[%s2263_s0 + $0x2d8] sm:$0xff] }
  0x32   :  { %247 = vmatmul.f32.gmra.mxu0 %v1461_v29  ;;  %329 = vmatmul.f32.gmra.mxu2 %v1466_v30  ;;  %v151_v27 = vld [vmem:[%s2263_s0 + $0x288] sm:$0xff] }
  0x33   :  { %192 = vperm.xlu1 %1102, %v68_v31   ;;  %394 = vmatpush.msrb.mxu0 %v144_v32  ;;  %v135_v31 = vld [vmem:[%s2263_s0 + $0x208] sm:$0xff]  ;;  %v1011_v32 = vld [vmem:[%s2263_s0 + $0x358] sm:$0xff] }
  0x34   :  { %288 = vmatmul.f32.gmra.mxu1 %v1477_v33  ;;  %693 = vmatpush.msrb.mxu3 %v1020_v34  ;;  %v150_v34 = vld [vmem:[%s2263_s0 + $0x280] sm:$0xff] }
  0x35   :  { %370 = vmatmul.f32.gmra.mxu3 %v1488_v35  ;;  %187 = vperm.xlu0 %1101, %v67_v36   ;;  %v994_v36 = vld [vmem:[%s2263_s0 + $0x2d0] sm:$0xff] }
  0x36   :  { %439 = vmatpush.msrb.mxu1 %v156_v37  ;;  %653 = vmatpush.msrb.mxu2 %v1003_v38  ;;  %v134_v37 = vld [vmem:[%s2263_s0 + $0x200] sm:$0xff]  ;;  %v1010_v38 = vld [vmem:[%s2263_s0 + $0x350] sm:$0xff] }
  0x37   :  { %395 = vmatpush.msrb.mxu0 %v143_v39  ;;  %694 = vmatpush.msrb.mxu3 %v1019_v40  ;;  %v1073_v39 = vld [vmem:[%s2263_s0 + $0x548] sm:$0xff]  ;;  %v1700_v40 = vld [vmem:[%s2264_s1 + $0x120] sm:$0xff] }
  0x38   :  { %654 = vmatpush.msrb.mxu2 %v1002_v41  ;;  %440 = vmatpush.msrb.mxu1 %v155_v42  ;;  %v1705_v41 = vld [vmem:[%s2264_s1 + $0x130] sm:$0xff]  ;;  %v1041_v42 = vld [vmem:[%s2263_s0 + $0x448] sm:$0xff] }
  0x39   :  { %396 = vmatpush.msrb.mxu0 %v142_v43  ;;  %695 = vmatpush.msrb.mxu3 %v1018_v44  ;;  %v1083_v43 = vld [vmem:[%s2263_s0 + $0x598] sm:$0xff]  ;;  %v1716_v44 = vld [vmem:[%s2264_s1 + $0x128] sm:$0xff] }
  0x3a   :  { %250 = vmatmul.f32.gmra.mxu0 %v1522_v45  ;;  %332 = vmatmul.f32.gmra.mxu2 %v1527_v46 }
  0x3b   :  { %197 = vperm.xlu1 %1102, %v69_v47   ;;  %655 = vmatpush.msrb.mxu2 %v1001_v48  ;;  %v1072_v47 = vld [vmem:[%s2263_s0 + $0x540] sm:$0xff]  ;;  %v1726_v48 = vld [vmem:[%s2264_s1 + $0x138] sm:$0xff] }
  0x3c   :  { %291 = vmatmul.f32.gmra.mxu1 %v1538_v49  ;;  %397 = vmatpush.msrb.mxu0 %v141_v50  ;;  %v1057_v50 = vld [vmem:[%s2263_s0 + $0x4c8] sm:$0xff] }
  0x3d   :  { %373 = vmatmul.f32.gmra.mxu3 %v1548_v51  ;;  %172 = vperm.xlu0 %1101, %v64_v52   ;;  %v1040_v52 = vld [vmem:[%s2263_s0 + $0x440] sm:$0xff] }
  0x3e   :  { %696 = vmatpush.msrb.mxu3 %v1017_v53  ;;  %1103 = vset.pattern.permute.xlu2 %v1136_v21  ;;  %v1645_v21 = vld [vmem:[%s2264_s1 + $0x100] sm:$0xff]  ;;  %v1071_v53 = vld [vmem:[%s2263_s0 + $0x538] sm:$0xff] }
  0x3f   :  { %441 = vmatpush.msrb.mxu1 %v154_v54  ;;  %656 = vmatpush.msrb.mxu2 %v1000_v55  ;;  %v1056_v54 = vld [vmem:[%s2263_s0 + $0x4c0] sm:$0xff]  ;;  %v1082_v55 = vld [vmem:[%s2263_s0 + $0x590] sm:$0xff] }
  0x40   :  { %162 = vperm.xlu2 %1103, %v62_v56   ;;  %398 = vmatpush.msrb.mxu0 %v140_v57  ;;  %v1039_v56 = vld [vmem:[%s2263_s0 + $0x438] sm:$0xff]  ;;  %v1070_v57 = vld [vmem:[%s2263_s0 + $0x530] sm:$0xff] }
  0x41   :  { %697 = vmatpush.msrb.mxu3 %v1016_v58  ;;  %657 = vmatpush.msrb.mxu2 %v999_v59  ;;  %v1055_v58 = vld [vmem:[%s2263_s0 + $0x4b8] sm:$0xff]  ;;  %v1081_v59 = vld [vmem:[%s2263_s0 + $0x588] sm:$0xff] }
  0x42   :  { %253 = vmatmul.f32.gmra.mxu0 %v1580_v60  ;;  %335 = vmatmul.f32.gmra.mxu2 %v1585_v61 }
  0x43   :  { %177 = vperm.xlu1 %1102, %v65_v0   ;;  %399 = vmatpush.msrb.mxu0 %v139_v1  ;;  %v1760_v0 = vld [vmem:[%s2264_s1 + $0x150] sm:$0xff]  ;;  %v1765_v1 = vld [vmem:[%s2264_s1 + $0x160] sm:$0xff] }
  0x44   :  { %294 = vmatmul.f32.gmra.mxu1 %v1596_v2  ;;  %698 = vmatpush.msrb.mxu3 %v1015_v5  ;;  %v1038_v5 = vld [vmem:[%s2263_s0 + $0x430] sm:$0xff] }
  0x45   :  { %376 = vmatmul.f32.gmra.mxu3 %v1606_v6  ;;  %442 = vmatpush.msrb.mxu1 %v153_v7  ;;  %v1054_v7 = vld [vmem:[%s2263_s0 + $0x4b0] sm:$0xff] }
  0x46   :  { %658 = vmatpush.msrb.mxu2 %v998_v8  ;;  %400 = vmatpush.msrb.mxu0 %v138_v9  ;;  %v1776_v8 = vld [vmem:[%s2264_s1 + $0x158] sm:$0xff]  ;;  %v1069_v9 = vld [vmem:[%s2263_s0 + $0x528] sm:$0xff] }
  0x47   :  { %699 = vmatpush.msrb.mxu3 %v1014_v10  ;;  %443 = vmatpush.msrb.mxu1 %v152_v11  ;;  %v1786_v10 = vld [vmem:[%s2264_s1 + $0x168] sm:$0xff] }
  0x48   :  { %167 = vperm.xlu2 %1103, %v63_v12   ;;  %659 = vmatpush.msrb.mxu2 %v997_v13  ;;  %v1037_v11 = vld [vmem:[%s2263_s0 + $0x428] sm:$0xff]  ;;  %v1068_v13 = vld [vmem:[%s2263_s0 + $0x520] sm:$0xff] }
  0x49   :  { %401 = vmatpush.msrb.mxu0 %v137_v16  ;;  %700 = vmatpush.msrb.mxu3 %v1013_v18  ;;  %v1053_v12 = vld [vmem:[%s2263_s0 + $0x4a8] sm:$0xff]  ;;  %v1036_v16 = vld [vmem:[%s2263_s0 + $0x420] sm:$0xff] }
  0x4a   :  { %256 = vmatmul.f32.gmra.mxu0 %v1640_v20  ;;  %338 = vmatmul.f32.gmra.mxu2 %v1645_v21  ;;  %v1080_v18 = vld [vmem:[%s2263_s0 + $0x580] sm:$0xff] }
  0x4b   :  { %660 = vmatpush.msrb.mxu2 %v996_v22  ;;  %402 = vmatpush.msrb.mxu0 %v136_v23  ;;  %v1052_v22 = vld [vmem:[%s2263_s0 + $0x4a0] sm:$0xff]  ;;  %v1067_v23 = vld [vmem:[%s2263_s0 + $0x518] sm:$0xff] }
  0x4c   :  { %297 = vmatmul.f32.gmra.mxu1 %v1656_v24  ;;  %701 = vmatpush.msrb.mxu3 %v1012_v25  ;;  %v1035_v25 = vld [vmem:[%s2263_s0 + $0x418] sm:$0xff] }
  0x4d   :  { %379 = vmatmul.f32.gmra.mxu3 %v1666_v26  ;;  %444 = vmatpush.msrb.mxu1 %v151_v27  ;;  %v1079_v27 = vld [vmem:[%s2263_s0 + $0x578] sm:$0xff] }
  0x4e   :  { %661 = vmatpush.msrb.mxu2 %v995_v28  ;;  %403 = vmatpush.msrb.mxu0 %v135_v31  ;;  %v1820_v28 = vld [vmem:[%s2264_s1 + $0x20] sm:$0xff]  ;;  %v1051_v31 = vld [vmem:[%s2263_s0 + $0x498] sm:$0xff] }
  0x4f   :  { %702 = vmatpush.msrb.mxu3 %v1011_v32  ;;  %445 = vmatpush.msrb.mxu1 %v150_v34  ;;  %v1066_v32 = vld [vmem:[%s2263_s0 + $0x510] sm:$0xff]  ;;  %v1831_v34 = vld [vmem:[%s2264_s1 + $0x28] sm:$0xff] }
  0x50   :  { %662 = vmatpush.msrb.mxu2 %v994_v36  ;;  %404 = vmatpush.msrb.mxu0 %v134_v37  ;;  %v1034_v36 = vld [vmem:[%s2263_s0 + $0x410] sm:$0xff] }
  0x51   :  { %703 = vmatpush.msrb.mxu3 %v1010_v38  ;;  %770 = vmatpush.msra.mxu1 %v1057_v50  ;;  %v1050_v37 = vld [vmem:[%s2263_s0 + $0x490] sm:$0xff]  ;;  %v1065_v38 = vld [vmem:[%s2263_s0 + $0x508] sm:$0xff]  ;;  %v1870_v50 = vld [vmem:[%s2264_s1 + $0x58] sm:$0xff] }
  0x52   :  { %811 = vmatpush.msra.mxu2 %v1073_v39  ;;  %259 = vmatmul.f32.gmra.mxu0 %v1700_v40  ;;  %v1078_v39 = vld [vmem:[%s2263_s0 + $0x570] sm:$0xff] }
  0x53   :  { %341 = vmatmul.f32.gmra.mxu2 %v1705_v41  ;;  %729 = vmatpush.msra.mxu0 %v1041_v42  ;;  %v1049_v42 = vld [vmem:[%s2263_s0 + $0x488] sm:$0xff] }
  0x54   :  { %858 = vmatpush.msra.mxu3 %v1083_v43  ;;  %300 = vmatmul.f32.gmra.mxu1 %v1716_v44  ;;  %v1064_v43 = vld [vmem:[%s2263_s0 + $0x500] sm:$0xff] }
  0x55   :  { %812 = vmatpush.msra.mxu2 %v1072_v47  ;;  %382 = vmatmul.f32.gmra.mxu3 %v1726_v48  ;;  %v1865_v47 = vld [vmem:[%s2264_s1 + $0x50] sm:$0xff] }
  0x56   :  { %730 = vmatpush.msra.mxu0 %v1040_v52  ;;  %771 = vmatpush.msra.mxu1 %v1056_v54  ;;  %v1048_v52 = vld [vmem:[%s2263_s0 + $0x480] sm:$0xff]  ;;  %v1077_v54 = vld [vmem:[%s2263_s0 + $0x568] sm:$0xff] }
  0x57   :  { %813 = vmatpush.msra.mxu2 %v1071_v53  ;;  %859 = vmatpush.msra.mxu3 %v1082_v55  ;;  %v1063_v53 = vld [vmem:[%s2263_s0 + $0x4f8] sm:$0xff] }
  0x58   :  { %731 = vmatpush.msra.mxu0 %v1039_v56  ;;  %772 = vmatpush.msra.mxu1 %v1055_v58  ;;  %v1047_v55 = vld [vmem:[%s2263_s0 + $0x478] sm:$0xff]  ;;  %v1062_v56 = vld [vmem:[%s2263_s0 + $0x4f0] sm:$0xff]  ;;  %v1904_v58 = vld [vmem:[%s2264_s1 + $0x80] sm:$0xff] }
  0x59   :  { %814 = vmatpush.msra.mxu2 %v1070_v57  ;;  %860 = vmatpush.msra.mxu3 %v1081_v59  ;;  %v1030_v57 = vld [vmem:[%s2263_s0 + $0x3f0] sm:$0xff]  ;;  %v1909_v59 = vld [vmem:[%s2264_s1 + $0x88] sm:$0xff] }
  0x5a   :  { %262 = vmatmul.f32.gmra.mxu0 %v1760_v0  ;;  %773 = vmatpush.msra.mxu1 %v1054_v7  ;;  %v1061_v7 = vld [vmem:[%s2263_s0 + $0x4e8] sm:$0xff] }
  0x5b   :  { %344 = vmatmul.f32.gmra.mxu2 %v1765_v1  ;;  %732 = vmatpush.msra.mxu0 %v1038_v5  ;;  %v1046_v5 = vld [vmem:[%s2263_s0 + $0x470] sm:$0xff] }
  0x5c   :  { %303 = vmatmul.f32.gmra.mxu1 %v1776_v8  ;;  %815 = vmatpush.msra.mxu2 %v1069_v9  ;;  %v1029_v9 = vld [vmem:[%s2263_s0 + $0x3e8] sm:$0xff] }
  0x5d   :  { %385 = vmatmul.f32.gmra.mxu3 %v1786_v10  ;;  %733 = vmatpush.msra.mxu0 %v1037_v11  ;;  %v1060_v11 = vld [vmem:[%s2263_s0 + $0x4e0] sm:$0xff] }
  0x5e   :  { %774 = vmatpush.msra.mxu1 %v1053_v12  ;;  %816 = vmatpush.msra.mxu2 %v1068_v13  ;;  %v1028_v12 = vld [vmem:[%s2263_s0 + $0x3e0] sm:$0xff]  ;;  %v1940_v13 = vld [vmem:[%s2264_s1 + $0xb0] sm:$0xff] }
  0x5f   :  { %734 = vmatpush.msra.mxu0 %v1036_v16  ;;  %861 = vmatpush.msra.mxu3 %v1080_v18  ;;  %v1945_v16 = vld [vmem:[%s2264_s1 + $0xb8] sm:$0xff]  ;;  %v1044_v18 = vld [vmem:[%s2263_s0 + $0x460] sm:$0xff] }
  0x60   :  { %775 = vmatpush.msra.mxu1 %v1052_v22  ;;  %817 = vmatpush.msra.mxu2 %v1067_v23  ;;  %v1059_v22 = vld [vmem:[%s2263_s0 + $0x4d8] sm:$0xff] }
  0x61   :  { %735 = vmatpush.msra.mxu0 %v1035_v25  ;;  %862 = vmatpush.msra.mxu3 %v1079_v27  ;;  %v1027_v23 = vld [vmem:[%s2263_s0 + $0x3d8] sm:$0xff]  ;;  %v1058_v25 = vld [vmem:[%s2263_s0 + $0x4d0] sm:$0xff] }
  0x62   :  { %405 = vmatmul.f32.vlgmr.msrb.gmra.mxu0 %v1820_v28  ;;  %776 = vmatpush.msra.mxu1 %v1051_v31  ;;  %v1074_v27 = vld [vmem:[%s2263_s0 + $0x550] sm:$0xff] }
  0x63   :  { %663 = vmatmul.f32.vlgmr.msrb.gmra.mxu2 %v1346_v62  ;;  %736 = vmatpush.msra.mxu0 %v1034_v36  ;;  %v1033_v62 = vld [vmem:[%s2263_s0 + $0x408] sm:$0xff]  ;;  %v1026_v31 = vld [vmem:[%s2263_s0 + $0x3d0] sm:$0xff] }
  0x64   :  { %818 = vmatpush.msra.mxu2 %v1066_v32  ;;  %982 = vmatmul.msk.f32.vlgmr.msrb.gmra.mxu1 %vm200_vm0, %v1831_v34  ;;  %v1981_v32 = vld [vmem:[%s2264_s1 + $0xe8] sm:$0xff]  ;;  %v1042_v36 = vld [vmem:[%s2263_s0 + $0x450] sm:$0xff] }
  0x65   :  { %704 = vmatmul.f32.vlgmr.msrb.gmra.mxu3 %v1365_v3  ;;  %777 = vmatpush.msra.mxu1 %v1050_v37  ;;  %v1032_v3 = vld [vmem:[%s2263_s0 + $0x400] sm:$0xff]  ;;  %v1994_v37 = vld [vmem:[%s2264_s1 + $0x110] sm:$0xff] }
  0x66   :  { %819 = vmatpush.msra.mxu2 %v1065_v38  ;;  %737 = vmatpush.msra.mxu0 %v1033_v62  ;;  %v1999_v38 = vld [vmem:[%s2264_s1 + $0x118] sm:$0xff] }
  0x67   :  { %863 = vmatpush.msra.mxu3 %v1078_v39  ;;  %778 = vmatpush.msra.mxu1 %v1049_v42 }
  0x68   :  { %820 = vmatpush.msra.mxu2 %v1064_v43  ;;  %738 = vmatpush.msra.mxu0 %v1032_v3 }
  0x69   :  { %779 = vmatpush.msra.mxu1 %v1048_v52  ;;  %864 = vmatpush.msra.mxu3 %v1077_v54 }
  0x6a   :  { %408 = vmatmul.f32.gmra.mxu0 %v1865_v47  ;;  %821 = vmatpush.msra.mxu2 %v1063_v53 }
  0x6b   :  { %666 = vmatmul.f32.gmra.mxu2 %v1406_v14  ;;  %v1031_v14 = vld [vmem:[%s2263_s0 + $0x3f8] sm:$0xff]  ;;  %780 = vmatpush.msra.mxu1 %v1047_v55 }
  0x6c   :  { %983 = vmatmul.msk.f32.gmra.mxu1 %vm200_vm0, %v1870_v50  ;;  %739 = vmatpush.msra.mxu0 %v1031_v14 }
  0x6d   :  { %707 = vmatmul.f32.gmra.mxu3 %v1419_v17  ;;  %v1076_v17 = vld [vmem:[%s2263_s0 + $0x560] sm:$0xff]  ;;  %822 = vmatpush.msra.mxu2 %v1062_v56 }
  0x6e   :  { %865 = vmatpush.msra.mxu3 %v1076_v17  ;;  %740 = vmatpush.msra.mxu0 %v1030_v57 }
  0x6f   :  { %781 = vmatpush.msra.mxu1 %v1046_v5  ;;  %823 = vmatpush.msra.mxu2 %v1061_v7 }
  0x70   :  { %741 = vmatpush.msra.mxu0 %v1029_v9 }
  0x71   :  { %824 = vmatpush.msra.mxu2 %v1060_v11 }
  0x72   :  { %411 = vmatmul.f32.gmra.mxu0 %v1904_v58 }
  0x73   :  { %669 = vmatmul.f32.gmra.mxu2 %v1461_v29  ;;  %v1045_v29 = vld [vmem:[%s2263_s0 + $0x468] sm:$0xff]  ;;  %742 = vmatpush.msra.mxu0 %v1028_v12 }
  0x74   :  { %984 = vmatmul.msk.f32.gmra.mxu1 %vm200_vm0, %v1909_v59  ;;  %825 = vmatpush.msra.mxu2 %v1059_v22 }
  0x75   :  { %710 = vmatmul.f32.gmra.mxu3 %v1477_v33  ;;  %782 = vmatpush.msra.mxu1 %v1045_v29  ;;  %v1075_v33 = vld [vmem:[%s2263_s0 + $0x558] sm:$0xff] }
  0x76   :  { %866 = vmatpush.msra.mxu3 %v1075_v33  ;;  %743 = vmatpush.msra.mxu0 %v1027_v23 }
  0x77   :  { %783 = vmatpush.msra.mxu1 %v1044_v18  ;;  %826 = vmatpush.msra.mxu2 %v1058_v25 }
  0x78   :  { %867 = vmatpush.msra.mxu3 %v1074_v27  ;;  %744 = vmatpush.msra.mxu0 %v1026_v31 }
  0x7a   :  { %414 = vmatmul.f32.gmra.mxu0 %v1940_v13 }
  0x7b   :  { %672 = vmatmul.f32.gmra.mxu2 %v1522_v45  ;;  %v1043_v45 = vld [vmem:[%s2263_s0 + $0x458] sm:$0xff] }
  0x7c   :  { %985 = vmatmul.msk.f32.gmra.mxu1 %vm200_vm0, %v1945_v16 }
  0x7d   :  { %713 = vmatmul.f32.gmra.mxu3 %v1538_v49  ;;  %784 = vmatpush.msra.mxu1 %v1043_v45  ;;  %v1973_v49 = vld [vmem:[%s2264_s1 + $0xe0] sm:$0xff] }
  0x7f   :  { %785 = vmatpush.msra.mxu1 %v1042_v36 }
  0x82   :  { %417 = vmatmul.f32.gmra.mxu0 %v1973_v49 }
  0x83   :  { %675 = vmatmul.f32.gmra.mxu2 %v1580_v60  ;;  %v2009_v60 = vld [vmem:[%s2264_s1 + $0x140] sm:$0xff] }
  0x84   :  { %986 = vmatmul.msk.f32.gmra.mxu1 %vm200_vm0, %v1981_v32 }
  0x85   :  { %716 = vmatmul.f32.gmra.mxu3 %v1596_v2  ;;  %v2014_v2 = vld [vmem:[%s2264_s1 + $0x148] sm:$0xff] }
  0x8a   :  { %420 = vmatmul.f32.gmra.mxu0 %v1994_v37 }
  0x8b   :  { %678 = vmatmul.f32.gmra.mxu2 %v1640_v20  ;;  %v2024_v20 = vld [vmem:[%s2264_s1 + $0x170] sm:$0xff] }
  0x8c   :  { %987 = vmatmul.msk.f32.gmra.mxu1 %vm200_vm0, %v1999_v38 }
  0x8d   :  { %719 = vmatmul.f32.gmra.mxu3 %v1656_v24  ;;  %v2029_v24 = vld [vmem:[%s2264_s1 + $0x178] sm:$0xff] }
  0x92   :  { %423 = vmatmul.f32.gmra.mxu0 %v2009_v60 }
  0x93   :  { %681 = vmatmul.f32.gmra.mxu2 %v1700_v40 }
  0x94   :  { %988 = vmatmul.msk.f32.gmra.mxu1 %vm200_vm0, %v2014_v2 }
  0x95   :  { %722 = vmatmul.f32.gmra.mxu3 %v1716_v44 }
  0x9a   :  { %426 = vmatmul.f32.gmra.mxu0 %v2024_v20  ;;  %v2033_v40 = vpop.permute.xlu2 %162 }
  0x9b   :  { %684 = vmatmul.f32.gmra.mxu2 %v1760_v0 }
  0x9c   :  { %989 = vmatmul.msk.f32.gmra.mxu1 %vm200_vm0, %v2029_v24 }
  0x9d   :  { %725 = vmatmul.f32.gmra.mxu3 %v1776_v8 }
  0x9f   :  { %v242_v44 = vpop.f32.mrf.mxu0  ;;  %v2038_v62 = vpop.permute.xlu0 %182 }
  0xa0   :  { %v243_v39 = vadd.f32 %v242_v44, %v2033_v40 }
  0xa1   :  { %v283_v42 = vpop.f32.mrf.mxu1 }
  0xa2   :  { %v284_v43 = vadd.f32 %v283_v42, %v243_v39  ;;  %745 = vmatmul.f32.vlgmr.msra.gmra.mxu0 %v1351_v63  ;;  %v2044_v0 = vpop.permute.xlu2 %167 }
  0xa3   :  { %827 = vmatmul.f32.vlgmr.msra.gmra.mxu2 %v1820_v28 }
  0xa4   :  { %786 = vmatmul.f32.vlgmr.msra.gmra.mxu1 %v1372_v4 }
  0xa5   :  { %1084 = vmatmul.msk.f32.vlgmr.msra.gmra.mxu3 %vm200_vm0, %v1831_v34  ;;  %v324_v3 = vpop.f32.mrf.mxu2  ;;  %v2048_v8 = vpop.permute.xlu1 %192 }
  0xa6   :  { %v325_v52 = vadd.f32 %v324_v3, %v284_v43 }
  0xa7   :  { %v245_v53 = vpop.f32.mrf.mxu0  ;;  %v2050_v54 = vpop.permute.xlu0 %187 }
  0xa8   :  { %v365_v14 = vpop.f32.mrf.mxu3  ;;  %v246_v55 = vadd.f32 %v245_v53, %v2044_v0 }
  0xa9   :  { %v2053_v63 = vadd.f32 %v365_v14, %v325_v52  ;;  %v286_v28 = vpop.f32.mrf.mxu1 }
  0xaa   :  { %v287_v56 = vadd.f32 %v286_v28, %v246_v55  ;;  %748 = vmatmul.f32.gmra.mxu0 %v1411_v15 }
  0xab   :  { %830 = vmatmul.f32.gmra.mxu2 %v1865_v47 }
  0xac   :  { %789 = vmatmul.f32.gmra.mxu1 %v1429_v19 }
  0xad   :  { %1085 = vmatmul.msk.f32.gmra.mxu3 %vm200_vm0, %v1870_v50  ;;  %v327_v4 = vpop.f32.mrf.mxu2  ;;  %v2060_v34 = vpop.permute.xlu1 %197 }
  0xae   :  { %v328_v57 = vadd.f32 %v327_v4, %v287_v56 }
  0xaf   :  { %v248_v17 = vpop.f32.mrf.mxu0  ;;  %v2062_v5 = vpop.permute.xlu0 %172 }
  0xb0   :  { %v368_v7 = vpop.f32.mrf.mxu3  ;;  %v249_v9 = vadd.f32 %v248_v17, %v2062_v5 }
  0xb1   :  { %v2065_v29 = vadd.f32 %v368_v7, %v328_v57  ;;  %v289_v15 = vpop.f32.mrf.mxu1 }
  0xb2   :  { %v290_v11 = vadd.f32 %v289_v15, %v249_v9  ;;  %751 = vmatmul.f32.gmra.mxu0 %v1466_v30 }
  0xb3   :  { %833 = vmatmul.f32.gmra.mxu2 %v1904_v58 }
  0xb4   :  { %792 = vmatmul.f32.gmra.mxu1 %v1488_v35 }
  0xb5   :  { %1086 = vmatmul.msk.f32.gmra.mxu3 %vm200_vm0, %v1909_v59  ;;  %v330_v19 = vpop.f32.mrf.mxu2  ;;  %v2072_v47 = vpop.permute.xlu1 %177 }
  0xb6   :  { %v331_v50 = vadd.f32 %v330_v19, %v290_v11 }
  0xb7   :  { %v251_v12 = vpop.f32.mrf.mxu0 }
  0xb8   :  { %v371_v33 = vpop.f32.mrf.mxu3  ;;  %v252_v18 = vadd.f32 %v251_v12, %v2072_v47 }
  0xb9   :  { %v2075_v22 = vadd.f32 %v371_v33, %v331_v50  ;;  %v292_v23 = vpop.f32.mrf.mxu1 }
  0xba   :  { %v293_v45 = vadd.f32 %v292_v23, %v252_v18  ;;  %754 = vmatmul.f32.gmra.mxu0 %v1527_v46 }
  0xbb   :  { %836 = vmatmul.f32.gmra.mxu2 %v1940_v13 }
  0xbc   :  { %795 = vmatmul.f32.gmra.mxu1 %v1548_v51 }
  0xbd   :  { %1087 = vmatmul.msk.f32.gmra.mxu3 %vm200_vm0, %v1945_v16  ;;  %v333_v30 = vpop.f32.mrf.mxu2 }
  0xbe   :  { %v334_v35 = vadd.f32 %v333_v30, %v293_v45 }
  0xbf   :  { %v254_v58 = vpop.f32.mrf.mxu0 }
  0xc0   :  { %v374_v59 = vpop.f32.mrf.mxu3  ;;  %v255_v53 = vadd.f32 %v254_v58, %v2038_v62 }
  0xc1   :  { %v2082_v25 = vadd.f32 %v374_v59, %v334_v35  ;;  %v295_v27 = vpop.f32.mrf.mxu1 }
  0xc2   :  { %757 = vmatmul.f32.gmra.mxu0 %v1585_v61  ;;  %v296_v14 = vadd.f32 %v295_v27, %v255_v53 }
  0xc3   :  { %839 = vmatmul.f32.gmra.mxu2 %v1973_v49 }
  0xc4   :  { %798 = vmatmul.f32.gmra.mxu1 %v1606_v6 }
  0xc5   :  { %1088 = vmatmul.msk.f32.gmra.mxu3 %vm200_vm0, %v1981_v32  ;;  %v336_v46 = vpop.f32.mrf.mxu2 }
  0xc7   :  { %v257_v51 = vpop.f32.mrf.mxu0 }
  0xc8   :  { %v377_v13 = vpop.f32.mrf.mxu3  ;;  %v258_v17 = vadd.f32 %v257_v51, %v2050_v54 }
  0xc9   :  { %v298_v16 = vpop.f32.mrf.mxu1 }
  0xca   :  { %760 = vmatmul.f32.gmra.mxu0 %v1645_v21  ;;  %v299_v15 = vadd.f32 %v298_v16, %v258_v17 }
  0xcb   :  { %842 = vmatmul.f32.gmra.mxu2 %v1994_v37 }
  0xcc   :  { %801 = vmatmul.f32.gmra.mxu1 %v1666_v26 }
  0xcd   :  { %1089 = vmatmul.msk.f32.gmra.mxu3 %vm200_vm0, %v1999_v38  ;;  %v339_v61 = vpop.f32.mrf.mxu2 }
  0xce   :  { %v340_v18 = vadd.f32 %v339_v61, %v299_v15 }
  0xcf   :  { %v260_v49 = vpop.f32.mrf.mxu0 }
  0xd0   :  { %v380_v31 = vpop.f32.mrf.mxu3  ;;  %v261_v23 = vadd.f32 %v260_v49, %v2048_v8 }
  0xd1   :  { %v301_v6 = vpop.f32.mrf.mxu1  ;;  %v381_v58 = vadd.f32 %v380_v31, %v340_v18 }
  0xd2   :  { %763 = vmatmul.f32.gmra.mxu0 %v1705_v41  ;;  %v302_v59 = vadd.f32 %v301_v6, %v261_v23 }
  0xd3   :  { %845 = vmatmul.f32.gmra.mxu2 %v2009_v60 }
  0xd4   :  { %804 = vmatmul.f32.gmra.mxu1 %v1726_v48 }
  0xd5   :  { %1090 = vmatmul.msk.f32.gmra.mxu3 %vm200_vm0, %v2014_v2 }
  0xd6   :  { %v342_v21 = vpop.f32.mrf.mxu2 }
  0xd7   :  { %v263_v32 = vpop.f32.mrf.mxu0 }
  0xd8   :  { %v383_v36 = vpop.f32.mrf.mxu3  ;;  %v264_v16 = vadd.f32 %v263_v32, %v2060_v34 }
  0xd9   :  { %v304_v26 = vpop.f32.mrf.mxu1 }
  0xda   :  { %766 = vmatmul.f32.gmra.mxu0 %v1765_v1 }
  0xdb   :  { %848 = vmatmul.f32.gmra.mxu2 %v2024_v20 }
  0xdc   :  { %807 = vmatmul.f32.gmra.mxu1 %v1786_v10 }
  0xdd   :  { %1091 = vmatmul.msk.f32.gmra.mxu3 %vm200_vm0, %v2029_v24 }
  0xde   :  { %v345_v41 = vpop.f32.mrf.mxu2 }
  0xdf   :  { %v2104_v37 = vpop.f32.mrf.mxu0 }
  0xe0   :  { %v2106_v48 = vpop.f32.mrf.mxu3 }
  0xe1   :  { %v2108_v38 = vpop.f32.mrf.mxu1 }
  0xe6   :  { %v664_v60 = vpop.f32.mrf.mxu2 }
  0xe7   :  { %v665_v2 = vadd.f32 %v664_v60, %v2033_v40  ;;  %v2111_v44 = vpop.f32.mrf.mxu0 }
  0xe8   :  { %v705_v1 = vpop.f32.mrf.mxu3 }
  0xe9   :  { %v2113_v39 = vadd.f32 %v705_v1, %v665_v2  ;;  %v2115_v20 = vpop.f32.mrf.mxu1 }
  0xee   :  { %v667_v10 = vpop.f32.mrf.mxu2 }
  0xef   :  { %v668_v24 = vadd.f32 %v667_v10, %v2044_v0  ;;  %v2118_v42 = vpop.f32.mrf.mxu0  ;;  %v337_v0 = vadd.f32 %v336_v46, %v296_v14 }
  0xf0   :  { %v708_v43 = vpop.f32.mrf.mxu3 }
  0xf1   :  { %v2120_v3 = vadd.f32 %v708_v43, %v668_v24  ;;  %v2122_v52 = vpop.f32.mrf.mxu1  ;;  %v378_v9 = vadd.f32 %v377_v13, %v337_v0  ;;  %v343_v13 = vadd.f32 %v342_v21, %v302_v59  ;;  %v305_v24 = vadd.f32 %v304_v26, %v264_v16 }
  0xf3   :  { %v384_v10 = vadd.f32 %v383_v36, %v343_v13 }
  0xf6   :  { %v670_v40 = vpop.f32.mrf.mxu2 }
  0xf7   :  { %v671_v55 = vadd.f32 %v670_v40, %v2062_v5  ;;  %v2126_v28 = vpop.f32.mrf.mxu0  ;;  %v346_v40 = vadd.f32 %v345_v41, %v305_v24  ;;  %v407_v41 = vadd.f32 %v2104_v37, %v2053_v63 }
  0xf8   :  { %v711_v56 = vpop.f32.mrf.mxu3 }
  0xf9   :  { %v2128_v4 = vadd.f32 %v711_v56, %v671_v55  ;;  %v2130_v57 = vpop.f32.mrf.mxu1  ;;  %v387_v17 = vadd.f32 %v2106_v48, %v346_v40 }
  0xfe   :  { %v673_v7 = vpop.f32.mrf.mxu2 }
  0xff   :  { %v674_v11 = vadd.f32 %v673_v7, %v2072_v47  ;;  %v418_v19 = vpop.f32.mrf.mxu0 }
 0x100   :  { %v419_v50 = vadd.f32 %v418_v19, %v378_v9  ;;  %v714_v12 = vpop.f32.mrf.mxu3 }
 0x101   :  { %v2134_v33 = vadd.f32 %v714_v12, %v674_v11  ;;  %v459_v5 = vpop.f32.mrf.mxu1 }
 0x102   :  { %v460_v45 = vadd.f32 %v459_v5, %v419_v50 }
 0x104   :  { %v990_v30 = vmul.f32 -1.442695, %v460_v45 }
 0x106   :  { %v2137_v35 = vpop.f32.mrf.mxu2  ;;  %1104 = vpow2.f32 %v990_v30  ;;  %v448_v30 = vadd.f32 %v2108_v38, %v407_v41 }
 0x107   :  { %v421_v27 = vpop.f32.mrf.mxu0 }
 0x108   :  { %v422_v46 = vadd.f32 %v421_v27, %v381_v58  ;;  %v2139_v51 = vpop.f32.mrf.mxu3 }
 0x109   :  { %v462_v47 = vpop.f32.mrf.mxu1 }
 0x10a   :  { %v463_v60 = vadd.f32 %v462_v47, %v422_v46 }
 0x10c   :  { %v1105_v2 = vpop.eup %1104  ;;  %v991_v61 = vmul.f32 -1.442695, %v463_v60 }
 0x10d   :  { %v483_v1 = vadd.f32 1.0, %v1105_v2 }
 0x10e   :  { %v2142_v49 = vpop.f32.mrf.mxu2  ;;  %1106 = vpow2.f32 %v991_v61  ;;  %v410_v61 = vadd.f32 %v2111_v44, %v2065_v29 }
 0x10f   :  { %1108 = vrcp.f32 %v483_v1  ;;  %v424_v31 = vpop.f32.mrf.mxu0  ;;  %v498_v11 = vand.u32 2147483648, %v483_v1  ;;  %v496_v12 = vand.u32 2147483647, %v483_v1  ;;  %vm492_vm2 = vweird.f32 %v483_v1 }
 0x110   :  { %v425_v6 = vadd.f32 %v424_v31, %v384_v10  ;;  %v2144_v43 = vpop.f32.mrf.mxu3 }
 0x111   :  { %v465_v53 = vpop.f32.mrf.mxu1  ;;  %v499_v58 = vor.u32 1.1754944e-38, %v498_v11  ;;  %vm497_vm4 = vcmp.eq.f32.partialorder %v496_v12, 8.507059e+37 }
 0x112   :  { %v466_v14 = vadd.f32 %v465_v53, %v425_v6 }
 0x114   :  { %v1107_v21 = vpop.eup %1106  ;;  %v992_v55 = vmul.f32 -1.442695, %v466_v14 }
 0x115   :  { %v1109_v32 = vpop.eup %1108  ;;  %v484_v56 = vadd.f32 1.0, %v1107_v21  ;;  %v451_v21 = vadd.f32 %v2115_v20, %v410_v61 }
 0x116   :  { %v2146_v0 = vpop.f32.mrf.mxu2  ;;  %v488_v7 = vmul.f32 %v1109_v32, %v483_v1  ;;  %1110 = vpow2.f32 %v992_v55  ;;  %vm493_vm1 = vweird.f32 %v1109_v32 }
 0x117   :  { %1112 = vrcp.f32 %v484_v56  ;;  %v427_v36 = vpop.f32.mrf.mxu0  ;;  %vm494_vm3 = vmor %vm492_vm2, %vm493_vm1  ;;  %v513_v2 = vand.u32 2147483648, %v484_v56  ;;  %v511_v10 = vand.u32 2147483647, %v484_v56  ;;  %vm507_vm7 = vweird.f32 %v484_v56 }
 0x118   :  { %v489_v26 = vsub.f32 1.0, %v488_v7  ;;  %v428_v9 = vadd.f32 %v427_v36, %v387_v17  ;;  %v2149_v15 = vpop.f32.mrf.mxu3 }
 0x119   :  { %v468_v19 = vpop.f32.mrf.mxu1  ;;  %v514_v53 = vor.u32 1.1754944e-38, %v513_v2  ;;  %vm512_vm9 = vcmp.eq.f32.partialorder %v511_v10, 8.507059e+37 }
 0x11a   :  { %v490_v50 = vmul.f32 %v1109_v32, %v489_v26  ;;  %v469_v5 = vadd.f32 %v468_v19, %v428_v9  ;;  %v413_v9 = vadd.f32 %v2118_v42, %v2075_v22 }
 0x11c   :  { %v1111_v18 = vpop.eup %1110  ;;  %v491_v23 = vadd.f32 %v1109_v32, %v490_v50  ;;  %v993_v48 = vmul.f32 -1.442695, %v469_v5  ;;  %v454_v5 = vadd.f32 %v2122_v52, %v413_v9 }
 0x11d   :  { %v1113_v45 = vpop.eup %1112  ;;  %v485_v59 = vadd.f32 1.0, %v1111_v18 }
 0x11e   :  { %v2154_v27 = vpop.f32.mrf.mxu2  ;;  %v495_v46 = vsel %vm494_vm3, %v1109_v32, %v491_v23  ;;  %v503_v63 = vmul.f32 %v1113_v45, %v484_v56  ;;  %1114 = vpow2.f32 %v993_v48  ;;  %vm508_vm6 = vweird.f32 %v1113_v45 }
 0x11f   :  { %v500_v37 = vsel %vm497_vm4, %v499_v58, %v495_v46  ;;  %1116 = vrcp.f32 %v485_v59  ;;  %v2156_v47 = vpop.f32.mrf.mxu0  ;;  %vm509_vm8 = vmor %vm507_vm7, %vm508_vm6  ;;  %v528_v56 = vand.u32 2147483648, %v485_v59  ;;  %v526_v41 = vand.u32 2147483647, %v485_v59 }
 0x120   :  { %v547_v13 = vmul.f32 %v500_v37, %v448_v30  ;;  %v504_v16 = vsub.f32 1.0, %v503_v63  ;;  %v2158_v60 = vpop.f32.mrf.mxu3  ;;  %vm522_vm11 = vweird.f32 %v485_v59 }
 0x121   :  { %v2160_v38 = vpop.f32.mrf.mxu1  ;;  %v529_v50 = vor.u32 1.1754944e-38, %v528_v56  ;;  %vm527_vm13 = vcmp.eq.f32.partialorder %v526_v41, 8.507059e+37 }
 0x122   :  { %552 = vst.msk [vmem:[%s2266_s3] sm:$0xff] %vm551_vm5, %v547_v13  ;;  %v505_v1 = vmul.f32 %v1113_v45, %v504_v16 }
 0x124   :  { %v1115_v24 = vpop.eup %1114  ;;  %v506_v31 = vadd.f32 %v1113_v45, %v505_v1 }
 0x125   :  { %v1117_v6 = vpop.eup %1116  ;;  %v486_v40 = vadd.f32 1.0, %v1115_v24 }
 0x126   :  { %v2168_v14 = vpop.f32.mrf.mxu2  ;;  %v510_v29 = vsel %vm509_vm8, %v1113_v45, %v506_v31  ;;  %v518_v44 = vmul.f32 %v1117_v6, %v485_v59  ;;  %vm523_vm10 = vweird.f32 %v1117_v6  ;;  %v416_v59 = vadd.f32 %v2126_v28, %v2082_v25 }
 0x127   :  { %v515_v55 = vsel %vm512_vm9, %v514_v53, %v510_v29  ;;  %1118 = vrcp.f32 %v486_v40  ;;  %v2171_v32 = vpop.f32.mrf.mxu0  ;;  %vm524_vm12 = vmor %vm522_vm11, %vm523_vm10  ;;  %v543_v58 = vand.u32 2147483648, %v486_v40  ;;  %v541_v63 = vand.u32 2147483647, %v486_v40 }
 0x128   :  { %v548_v17 = vmul.f32 %v515_v55, %v451_v21  ;;  %v519_v7 = vsub.f32 1.0, %v518_v44  ;;  %v2173_v36 = vpop.f32.mrf.mxu3  ;;  %vm537_vm15 = vweird.f32 %v486_v40  ;;  %v457_v2 = vadd.f32 %v2130_v57, %v416_v59 }
 0x129   :  { %v2175_v26 = vpop.f32.mrf.mxu1  ;;  %v544_v13 = vor.u32 1.1754944e-38, %v543_v58  ;;  %vm542_vm1 = vcmp.eq.f32.partialorder %v541_v63, 8.507059e+37  ;;  %v677_v31 = vadd.f32 %v2137_v35, %v2038_v62  ;;  %v680_v44 = vadd.f32 %v2142_v49, %v2050_v54 }
 0x12a   :  { %553 = vst.msk [vmem:[%s2266_s3 + $0x8] sm:$0xff] %vm551_vm5, %v548_v17  ;;  %v520_v20 = vmul.f32 %v1117_v6, %v519_v7 }
 0x12b   :  { %v718_v57 = vadd.f32 %v2139_v51, %v677_v31  ;;  %v721_v62 = vadd.f32 %v2144_v43, %v680_v44  ;;  %v683_v51 = vadd.f32 %v2146_v0, %v2048_v8 }
 0x12c   :  { %v521_v11 = vadd.f32 %v1117_v6, %v520_v20 }
 0x12d   :  { %v1119_v19 = vpop.eup %1118  ;;  %v724_v54 = vadd.f32 %v2149_v15, %v683_v51 }
 0x12e   :  { %v2183_v12 = vpop.f32.mrf.mxu2  ;;  %v525_v18 = vsel %vm524_vm12, %v1117_v6, %v521_v11  ;;  %v533_v22 = vmul.f32 %v1119_v19, %v486_v40  ;;  %vm538_vm14 = vweird.f32 %v1119_v19 }
 0x12f   :  { %v530_v42 = vsel %vm527_vm13, %v529_v50, %v525_v18  ;;  %v2186_v23 = vpop.f32.mrf.mxu0  ;;  %vm539_vm0 = vmor %vm537_vm15, %vm538_vm14 }
 0x130   :  { %v549_v48 = vmul.f32 %v530_v42, %v454_v5  ;;  %v534_v45 = vsub.f32 1.0, %v533_v22  ;;  %v2188_v30 = vpop.f32.mrf.mxu3 }
 0x131   :  { %v2190_v46 = vpop.f32.mrf.mxu1 }
 0x132   :  { %554 = vst.msk [vmem:[%s2266_s3 + $0x10] sm:$0xff] %vm551_vm5, %v549_v48  ;;  %v535_v52 = vmul.f32 %v1119_v19, %v534_v45  ;;  %v686_v45 = vadd.f32 %v2154_v27, %v2060_v34 }
 0x134   :  { %v536_v37 = vadd.f32 %v1119_v19, %v535_v52  ;;  %v727_v52 = vadd.f32 %v2158_v60, %v686_v45 }
 0x136   :  { %v2198_v16 = vpop.f32.mrf.mxu2  ;;  %v540_v61 = vsel %vm539_vm0, %v1119_v19, %v536_v37 }
 0x137   :  { %v545_v1 = vsel %vm542_vm1, %v544_v13, %v540_v61  ;;  %v2201_v25 = vpop.f32.mrf.mxu0  ;;  %v747_v61 = vadd.f32 %v2156_v47, %v2113_v39 }
 0x138   :  { %v550_v28 = vmul.f32 %v545_v1, %v457_v2  ;;  %v2203_v10 = vpop.f32.mrf.mxu3 }
 0x139   :  { %v2205_v24 = vpop.f32.mrf.mxu1 }
 0x13a   :  { %555 = vst.msk [vmem:[%s2266_s3 + $0x18] sm:$0xff] %vm551_vm5, %v550_v28 }
 0x13e   :  { %v2213_v6 = vpop.f32.mrf.mxu2 }
 0x13f   :  { %v758_v53 = vpop.f32.mrf.mxu0 }
 0x140   :  { %v759_v40 = vadd.f32 %v758_v53, %v718_v57  ;;  %v2216_v21 = vpop.f32.mrf.mxu3 }
 0x141   :  { %v799_v29 = vpop.f32.mrf.mxu1 }
 0x142   :  { %v800_v55 = vadd.f32 %v799_v29, %v759_v40  ;;  %v788_v29 = vadd.f32 %v2160_v38, %v747_v61 }
 0x146   :  { %v840_v17 = vpop.f32.mrf.mxu2 }
 0x147   :  { %v841_v35 = vadd.f32 %v840_v17, %v800_v55  ;;  %v761_v7 = vpop.f32.mrf.mxu0  ;;  %v829_v55 = vadd.f32 %v2168_v14, %v788_v29 }
 0x148   :  { %v762_v56 = vadd.f32 %v761_v7, %v721_v62  ;;  %v881_v9 = vpop.f32.mrf.mxu3 }
 0x149   :  { %v882_v20 = vadd.f32 %v881_v9, %v841_v35  ;;  %v802_v41 = vpop.f32.mrf.mxu1  ;;  %v870_v38 = vadd.f32 %v2173_v36, %v829_v55 }
 0x14a   :  { %v803_v19 = vadd.f32 %v802_v41, %v762_v56  ;;  %v750_v56 = vadd.f32 %v2171_v32, %v2120_v3 }
 0x14b   :  { %v1092_v11 = vmul.f32 -1.442695, %v882_v20 }
 0x14d   :  { %1120 = vpow2.f32 %v1092_v11 }
 0x14e   :  { %v843_v50 = vpop.f32.mrf.mxu2 }
 0x14f   :  { %v844_v5 = vadd.f32 %v843_v50, %v803_v19  ;;  %v764_v49 = vpop.f32.mrf.mxu0 }
 0x150   :  { %v884_v18 = vpop.f32.mrf.mxu3  ;;  %v765_v22 = vadd.f32 %v764_v49, %v724_v54 }
 0x151   :  { %v885_v43 = vadd.f32 %v884_v18, %v844_v5  ;;  %v805_v42 = vpop.f32.mrf.mxu1  ;;  %v791_v5 = vadd.f32 %v2175_v26, %v750_v56 }
 0x152   :  { %v806_v8 = vadd.f32 %v805_v42, %v765_v22 }
 0x153   :  { %v1121_v48 = vpop.eup %1120  ;;  %v1093_v58 = vmul.f32 -1.442695, %v885_v43  ;;  %v832_v32 = vadd.f32 %v2183_v12, %v791_v5  ;;  %v753_v43 = vadd.f32 %v2186_v23, %v2128_v4 }
 0x154   :  { %v905_v59 = vadd.f32 1.0, %v1121_v48 }
 0x155   :  { %1122 = vpow2.f32 %v1093_v58  ;;  %v873_v12 = vadd.f32 %v2188_v30, %v832_v32 }
 0x156   :  { %v846_v0 = vpop.f32.mrf.mxu2  ;;  %1124 = vrcp.f32 %v905_v59  ;;  %v920_v17 = vand.u32 2147483648, %v905_v59  ;;  %v918_v39 = vand.u32 2147483647, %v905_v59  ;;  %vm914_vm3 = vweird.f32 %v905_v59 }
 0x157   :  { %v847_v63 = vadd.f32 %v846_v0, %v806_v8  ;;  %v767_v37 = vpop.f32.mrf.mxu0  ;;  %v794_v0 = vadd.f32 %v2190_v46, %v753_v43 }
 0x158   :  { %v887_v15 = vpop.f32.mrf.mxu3  ;;  %v768_v13 = vadd.f32 %v767_v37, %v727_v52  ;;  %v921_v51 = vor.u32 1.1754944e-38, %v920_v17  ;;  %vm919_vm6 = vcmp.eq.f32.partialorder %v918_v39, 8.507059e+37 }
 0x159   :  { %v888_v2 = vadd.f32 %v887_v15, %v847_v63  ;;  %v808_v1 = vpop.f32.mrf.mxu1  ;;  %v835_v4 = vadd.f32 %v2198_v16, %v794_v0  ;;  %v756_v15 = vadd.f32 %v2201_v25, %v2134_v33 }
 0x15a   :  { %v809_v53 = vadd.f32 %v808_v1, %v768_v13 }
 0x15b   :  { %v1123_v28 = vpop.eup %1122  ;;  %v1094_v31 = vmul.f32 -1.442695, %v888_v2  ;;  %v876_v61 = vadd.f32 %v2203_v10, %v835_v4 }
 0x15c   :  { %v1125_v34 = vpop.eup %1124  ;;  %v906_v27 = vadd.f32 1.0, %v1123_v28 }
 0x15d   :  { %v910_v57 = vmul.f32 %v1125_v34, %v905_v59  ;;  %1126 = vpow2.f32 %v1094_v31  ;;  %vm915_vm2 = vweird.f32 %v1125_v34  ;;  %v797_v31 = vadd.f32 %v2205_v24, %v756_v15 }
 0x15e   :  { %v849_v40 = vpop.f32.mrf.mxu2  ;;  %1128 = vrcp.f32 %v906_v27  ;;  %vm916_vm4 = vmor %vm914_vm3, %vm915_vm2  ;;  %v935_v3 = vand.u32 2147483648, %v906_v27  ;;  %v933_v18 = vand.u32 2147483647, %v906_v27  ;;  %vm929_vm8 = vweird.f32 %v906_v27 }
 0x15f   :  { %v911_v60 = vsub.f32 1.0, %v910_v57  ;;  %v850_v44 = vadd.f32 %v849_v40, %v809_v53  ;;  %v838_v53 = vadd.f32 %v2213_v6, %v797_v31 }
 0x160   :  { %v890_v62 = vpop.f32.mrf.mxu3  ;;  %v936_v48 = vor.u32 1.1754944e-38, %v935_v3  ;;  %vm934_vm10 = vcmp.eq.f32.partialorder %v933_v18, 8.507059e+37 }
 0x161   :  { %v912_v35 = vmul.f32 %v1125_v34, %v911_v60  ;;  %v891_v47 = vadd.f32 %v890_v62, %v850_v44  ;;  %v879_v29 = vadd.f32 %v2216_v21, %v838_v53 }
 0x163   :  { %v1127_v7 = vpop.eup %1126  ;;  %v913_v9 = vadd.f32 %v1125_v34, %v912_v35  ;;  %v1095_v20 = vmul.f32 -1.442695, %v891_v47 }
 0x164   :  { %v1129_v41 = vpop.eup %1128  ;;  %v907_v11 = vadd.f32 1.0, %v1127_v7 }
 0x165   :  { %v917_v14 = vsel %vm916_vm4, %v1125_v34, %v913_v9  ;;  %v925_v19 = vmul.f32 %v1129_v41, %v906_v27  ;;  %1130 = vpow2.f32 %v1095_v20  ;;  %vm930_vm7 = vweird.f32 %v1129_v41 }
 0x166   :  { %v922_v50 = vsel %vm919_vm6, %v921_v51, %v917_v14  ;;  %1132 = vrcp.f32 %v907_v11  ;;  %vm931_vm9 = vmor %vm929_vm8, %vm930_vm7  ;;  %v950_v37 = vand.u32 2147483648, %v907_v11  ;;  %v948_v30 = vand.u32 2147483647, %v907_v11 }
 0x167   :  { %v969_v54 = vmul.f32 %v922_v50, %v870_v38  ;;  %v926_v49 = vsub.f32 1.0, %v925_v19  ;;  %vm944_vm12 = vweird.f32 %v907_v11 }
 0x168   :  { %v951_v46 = vor.u32 1.1754944e-38, %v950_v37  ;;  %vm949_vm14 = vcmp.eq.f32.partialorder %v948_v30, 8.507059e+37 }
 0x169   :  { %1096 = vst.msk [vmem:[%s2266_s3 + $0x20] sm:$0xff] %vm551_vm5, %v969_v54  ;;  %v927_v36 = vmul.f32 %v1129_v41, %v926_v49 }
 0x16b   :  { %v1131_v22 = vpop.eup %1130  ;;  %v928_v42 = vadd.f32 %v1129_v41, %v927_v36 }
 0x16c   :  { %v1133_v26 = vpop.eup %1132  ;;  %v908_v45 = vadd.f32 1.0, %v1131_v22 }
 0x16d   :  { %v932_v58 = vsel %vm931_vm9, %v1129_v41, %v928_v42  ;;  %v940_v59 = vmul.f32 %v1133_v26, %v907_v11  ;;  %vm945_vm11 = vweird.f32 %v1133_v26 }
 0x16e   :  { %v937_v8 = vsel %vm934_vm10, %v936_v48, %v932_v58  ;;  %1134 = vrcp.f32 %v908_v45  ;;  %vm946_vm13 = vmor %vm944_vm12, %vm945_vm11  ;;  %v965_v57 = vand.u32 2147483648, %v908_v45  ;;  %v963_v25 = vand.u32 2147483647, %v908_v45 }
 0x16f   :  { %v970_v52 = vmul.f32 %v937_v8, %v873_v12  ;;  %v941_v63 = vsub.f32 1.0, %v940_v59  ;;  %vm959_vm0 = vweird.f32 %v908_v45 }
 0x170   :  { %v966_v40 = vor.u32 1.1754944e-38, %v965_v57  ;;  %vm964_vm2 = vcmp.eq.f32.partialorder %v963_v25, 8.507059e+37 }
 0x171   :  { %1097 = vst.msk [vmem:[%s2266_s3 + $0x28] sm:$0xff] %vm551_vm5, %v970_v52  ;;  %v942_v23 = vmul.f32 %v1133_v26, %v941_v63 }
 0x173   :  { %v943_v13 = vadd.f32 %v1133_v26, %v942_v23 }
 0x174   :  { %v1135_v2 = vpop.eup %1134 }
 0x175   :  { %v947_v1 = vsel %vm946_vm13, %v1133_v26, %v943_v13  ;;  %v955_v16 = vmul.f32 %v1135_v2, %v908_v45  ;;  %vm960_vm15 = vweird.f32 %v1135_v2 }
 0x176   :  { %v952_v28 = vsel %vm949_vm14, %v951_v46, %v947_v1  ;;  %vm961_vm1 = vmor %vm959_vm0, %vm960_vm15 }
 0x177   :  { %v971_v34 = vmul.f32 %v952_v28, %v876_v61  ;;  %v956_v27 = vsub.f32 1.0, %v955_v16 }
 0x179   :  { %1098 = vst.msk [vmem:[%s2266_s3 + $0x30] sm:$0xff] %vm551_vm5, %v971_v34  ;;  %v957_v33 = vmul.f32 %v1135_v2, %v956_v27 }
 0x17b   :  { %v958_v10 = vadd.f32 %v1135_v2, %v957_v33 }
 0x17d   :  { %v962_v24 = vsel %vm961_vm1, %v1135_v2, %v958_v10 }
 0x17e   :  { %v967_v60 = vsel %vm964_vm2, %v966_v40, %v962_v24 }
 0x17f   :  { %v972_v44 = vmul.f32 %v967_v60, %v879_v29 }
 0x181   :  { %1099 = vst.msk [vmem:[%s2266_s3 + $0x38] sm:$0xff] %vm551_vm5, %v972_v44 }

</bundles_post_ra>
